<compile_context>
chip_gen: v5e
topology: v5e:2x2
jax: 0.10.0
libtpu: 0.0.40
codegen_flags: <defaults>
</compile_context>

<pallas_src>
import math
import jax
import jax.numpy as jnp
from jax.experimental import pallas as pl
from jax.experimental.pallas import tpu as pltpu


# ----------------------------------------------------------------------------
# Pallas kernel: 2-layer LSTM forward, wavefront-scheduled, all state in regs.
# ----------------------------------------------------------------------------
def lstm2_wavefront_kernel(x_ref, wih0_ref, whh0_ref, b0_ref,
                           wih1_ref, whh1_ref, b1_ref,
                           y_ref, hn_ref, cn_ref):
    # x_ref   : (T*Bp, H_in)  time-major flattened input, f32
    # wih*_ref: (H_in|H, 4H)  input->gates weights (x @ W layout), bf16
    # whh*_ref: (H, 4H)       hidden->gates weights (h @ W layout), bf16
    # b*_ref  : (1, 4H)       combined bias (b_ih + b_hh), f32
    # y_ref   : (Bp, T*H)     layer-1 output sequence as one lane-dense slab
    # hn_ref  : (2, Bp, H)    final hidden state per layer
    # cn_ref  : (2, Bp, H)    final cell state per layer
    Bp = y_ref.shape[0]
    H = whh0_ref.shape[0]
    T = y_ref.shape[1] // H

    # Load weights/biases once (hoisted out of the recurrence).
    wih0 = wih0_ref[...]
    whh0 = whh0_ref[...]
    wih1 = wih1_ref[...]
    whh1 = whh1_ref[...]
    b0 = b0_ref[...]
    b1 = b1_ref[...]

    # Hoisted layer-0 input projection: all T steps in one bf16 MXU call.
    x_bf = x_ref[...].astype(jnp.bfloat16)                               # (T*Bp, H_in)
    gx0 = jnp.dot(x_bf, wih0, preferred_element_type=jnp.float32) + b0   # (T*Bp, 4H) f32

    def cell(gates, c):
        # Full-width activations: two EUP ops on the (Bp, 4H) vreg, then slice.
        sig = jax.nn.sigmoid(gates)
        tnh = jnp.tanh(gates)
        i_g = sig[:, 0 * H:1 * H]
        f_g = sig[:, 1 * H:2 * H]
        g_g = tnh[:, 2 * H:3 * H]
        o_g = sig[:, 3 * H:4 * H]
        c_new = f_g * c + i_g * g_g
        h_new = o_g * jnp.tanh(c_new)
        return h_new, c_new

    zeros = jnp.zeros((Bp, H), jnp.float32)
    h0, c0 = zeros, zeros
    h1, c1 = zeros, zeros
    h1_cols = [None] * T

    # Wavefront: wave w computes layer 0 at t=w and layer 1 at t=w-1, feeding
    # layer 1 from the h0 produced one wave earlier. The two cells within a
    # wave are independent, so their tiny matmuls + gate math can overlap.
    for w in range(T + 1):
        h0_prev = h0                                   # layer-0 h at time w-1
        if w < T:
            g0 = gx0[w * Bp:(w + 1) * Bp, :] + jnp.dot(
                h0.astype(jnp.bfloat16), whh0, preferred_element_type=jnp.float32)
            h0, c0 = cell(g0, c0)
        if w >= 1:
            x1 = h0_prev.astype(jnp.bfloat16)
            g1 = (jnp.dot(x1, wih1, preferred_element_type=jnp.float32) + b1
                  + jnp.dot(h1.astype(jnp.bfloat16), whh1,
                            preferred_element_type=jnp.float32))
            h1, c1 = cell(g1, c1)
            h1_cols[w - 1] = h1

    # Single lane-dense unmasked store of the whole output sequence.
    y_ref[...] = jnp.concatenate(h1_cols, axis=1)      # (Bp, T*H)
    hn_ref[0, :, :] = h0
    hn_ref[1, :, :] = h1
    cn_ref[0, :, :] = c0
    cn_ref[1, :, :] = c1


# ----------------------------------------------------------------------------
# Wrapper: padding, time-major flatten, pallas_call plumbing, un-pad/reshape.
# ----------------------------------------------------------------------------
def decoder_rnn_forward(h_seq, wih0_t, whh0_t, b0, wih1_t, whh1_t, b1):
    """h_seq: (B, T, hidden_dim) f32, batch-first like nn.LSTM(batch_first=True).

    wih*_t: (H_in|H, 4H) bf16 (pre-transposed for x @ W)
    whh*_t: (H, 4H)      bf16
    b*    : (1, 4H)      f32  (= b_ih + b_hh)
    Returns (d_seq, (h_n, c_n)) matching the PyTorch module.
    """
    B, T, H_in = h_seq.shape
    H = whh0_t.shape[0]
    H4 = 4 * H
    L = 2
    assert wih0_t.shape == (H_in, H4)
    assert wih1_t.shape == (H, H4) and whh1_t.shape == (H, H4)

    # Zero-pad the batch to a full sublane group (padding rows are discarded).
    Bp = ((B + 7) // 8) * 8
    x_p = jnp.pad(h_seq, ((0, Bp - B), (0, 0), (0, 0)))
    # Time-major flattened: step t is rows [t*Bp, (t+1)*Bp) — a contiguous,
    # sublane-aligned static slice inside the kernel (no in-kernel relayout).
    x_tm = jnp.transpose(x_p, (1, 0, 2)).reshape(T * Bp, H_in)

    y_slab, hn_p, cn_p = pl.pallas_call(
        lstm2_wavefront_kernel,
        out_shape=(
            jax.ShapeDtypeStruct((Bp, T * H), jnp.float32),   # d_seq slab
            jax.ShapeDtypeStruct((L, Bp, H), jnp.float32),    # h_n (padded)
            jax.ShapeDtypeStruct((L, Bp, H), jnp.float32),    # c_n (padded)
        ),
        grid=(1,),
        in_specs=[
            pl.BlockSpec((T * Bp, H_in), lambda i: (0, 0)),
            pl.BlockSpec((H_in, H4), lambda i: (0, 0)),
            pl.BlockSpec((H, H4), lambda i: (0, 0)),
            pl.BlockSpec((1, H4), lambda i: (0, 0)),
            pl.BlockSpec((H, H4), lambda i: (0, 0)),
            pl.BlockSpec((H, H4), lambda i: (0, 0)),
            pl.BlockSpec((1, H4), lambda i: (0, 0)),
        ],
        out_specs=(
            pl.BlockSpec((Bp, T * H), lambda i: (0, 0)),
            pl.BlockSpec((L, Bp, H), lambda i: (0, 0, 0)),
            pl.BlockSpec((L, Bp, H), lambda i: (0, 0, 0)),
        ),
        compiler_params=pltpu.CompilerParams(
            dimension_semantics=("arbitrary",)),
    )(x_tm, wih0_t, whh0_t, b0, wih1_t, whh1_t, b1)

    # Free reshapes/slices on tiny tensors; kernel already emits (L, B, H) order.
    d_seq = y_slab[:B].reshape(B, T, H)
    h_n = hn_p[:, :B, :]
    c_n = cn_p[:, :B, :]
    return d_seq, (h_n, c_n)


# ----------------------------------------------------------------------------
# Deterministic parameter init (PyTorch LSTM shapes, uniform(-1/sqrt(H), 1/sqrt(H))).
# ----------------------------------------------------------------------------
def init_lstm_params(key, hidden_dim, latent_dim, num_layers):
    k = 1.0 / math.sqrt(latent_dim)
    wih_list, whh_list, bih_list, bhh_list = [], [], [], []
    for l in range(num_layers):
        in_dim = hidden_dim if l == 0 else latent_dim
        key, k1, k2, k3, k4 = jax.random.split(key, 5)
        wih_list.append(jax.random.uniform(k1, (4 * latent_dim, in_dim), jnp.float32, -k, k))
        whh_list.append(jax.random.uniform(k2, (4 * latent_dim, latent_dim), jnp.float32, -k, k))
        bih_list.append(jax.random.uniform(k3, (4 * latent_dim,), jnp.float32, -k, k))
        bhh_list.append(jax.random.uniform(k4, (4 * latent_dim,), jnp.float32, -k, k))
    return wih_list, whh_list, bih_list, bhh_list


def pack_params(wih_list, whh_list, bih_list, bhh_list):
    # Transpose so the kernel does x @ W directly, pre-cast MXU operands to
    # bf16 (accumulation stays f32 in-kernel), combine biases (hoisted).
    assert len(wih_list) == 2, "kernel is specialized to num_layers=2"
    packed = []
    for wih, whh, bih, bhh in zip(wih_list, whh_list, bih_list, bhh_list):
        packed.append(jnp.asarray(wih.T, jnp.bfloat16))            # (H_in, 4H)
        packed.append(jnp.asarray(whh.T, jnp.bfloat16))            # (H,    4H)
        packed.append((bih + bhh)[None, :].astype(jnp.float32))    # (1,    4H)
    return tuple(packed)   # (wih0, whh0, b0, wih1, whh1, b1)


# ----------------------------------------------------------------------------
# Pure-JAX f32 reference (same math as torch.nn.LSTM forward) for validation.
# ----------------------------------------------------------------------------
def lstm_ref(x, wih_list, whh_list, bih_list, bhh_list):
    B, T, _ = x.shape
    L = len(wih_list)
    inp = x
    hs, cs = [], []
    for l in range(L):
        H = whh_list[l].shape[1]
        h = jnp.zeros((B, H), jnp.float32)
        c = jnp.zeros((B, H), jnp.float32)
        outs = []
        for t in range(T):
            g = inp[:, t] @ wih_list[l].T + h @ whh_list[l].T + bih_list[l] + bhh_list[l]
            i_g = jax.nn.sigmoid(g[:, :H])
            f_g = jax.nn.sigmoid(g[:, H:2 * H])
            g_g = jnp.tanh(g[:, 2 * H:3 * H])
            o_g = jax.nn.sigmoid(g[:, 3 * H:])
            c = f_g * c + i_g * g_g
            h = o_g * jnp.tanh(c)
            outs.append(h)
        inp = jnp.stack(outs, axis=1)
        hs.append(h)
        cs.append(c)
    return inp, (jnp.stack(hs, axis=0), jnp.stack(cs, axis=0))


if __name__ == "__main__":
    HIDDEN_DIM = 32
    LATENT_DIM = 32
    NUM_LAYERS = 2
    B, T = 2, 8

    key = jax.random.PRNGKey(0)
    key, kx = jax.random.split(key)
    h_seq = jax.random.normal(kx, (B, T, HIDDEN_DIM), jnp.float32)

    wih_list, whh_list, bih_list, bhh_list = init_lstm_params(
        key, HIDDEN_DIM, LATENT_DIM, NUM_LAYERS
    )
    params = pack_params(wih_list, whh_list, bih_list, bhh_list)

    d_seq, (h_n, c_n) = decoder_rnn_forward(h_seq, *params)
    d_seq = jax.block_until_ready(d_seq)
    h_n = jax.block_until_ready(h_n)
    c_n = jax.block_until_ready(c_n)

    # Shape checks (match PyTorch: d_seq (B,T,latent), h_n/c_n (L,B,latent)).
    assert d_seq.shape == (B, T, LATENT_DIM)
    assert h_n.shape == (NUM_LAYERS, B, LATENT_DIM)
    assert c_n.shape == (NUM_LAYERS, B, LATENT_DIM)

    # Numerical check against a pure-f32 JAX reference of the same LSTM math.
    # Tolerances loosened vs. the f32-only kernel because MXU operands are bf16
    # (f32 accumulation); gate/state math remains f32.
    d_ref, (h_ref, c_ref) = lstm_ref(h_seq, wih_list, whh_list, bih_list, bhh_list)
    assert jnp.allclose(d_seq, d_ref, rtol=2e-2, atol=2e-2), "d_seq mismatch"
    assert jnp.allclose(h_n, h_ref, rtol=2e-2, atol=2e-2), "h_n mismatch"
    assert jnp.allclose(c_n, c_ref, rtol=2e-2, atol=2e-2), "c_n mismatch"

    print("KERNEL_OK")
</pallas_src>

<mosaic_0001>
module attributes {stable_mosaic.version = 11 : i64} {
  func.func @lstm2_wavefront_kernel(%arg0: i32, %arg1: memref<64x32xf32, #tpu.memory_space<vmem>>, %arg2: memref<32x128xbf16, #tpu.memory_space<vmem>>, %arg3: memref<32x128xbf16, #tpu.memory_space<vmem>>, %arg4: memref<1x128xf32, #tpu.memory_space<vmem>>, %arg5: memref<32x128xbf16, #tpu.memory_space<vmem>>, %arg6: memref<32x128xbf16, #tpu.memory_space<vmem>>, %arg7: memref<1x128xf32, #tpu.memory_space<vmem>>, %arg8: memref<8x256xf32, #tpu.memory_space<vmem>>, %arg9: memref<2x8x32xf32, #tpu.memory_space<vmem>>, %arg10: memref<2x8x32xf32, #tpu.memory_space<vmem>>) attributes {dimension_semantics = [#tpu.dimension_semantics<arbitrary>], iteration_bounds = array<i64: 1>, scalar_prefetch = 0 : i64, scratch_operands = 0 : i64, tpu.core_type = #tpu.core_type<tc>, window_params = [{pipeline_mode = #tpu.pipeline_mode<synchronous>, transform_indices = @transform_0, window_bounds = array<i64: 64, 32>}, {pipeline_mode = #tpu.pipeline_mode<synchronous>, transform_indices = @transform_1, window_bounds = array<i64: 32, 128>}, {pipeline_mode = #tpu.pipeline_mode<synchronous>, transform_indices = @transform_2, window_bounds = array<i64: 32, 128>}, {pipeline_mode = #tpu.pipeline_mode<synchronous>, transform_indices = @transform_3, window_bounds = array<i64: 1, 128>}, {pipeline_mode = #tpu.pipeline_mode<synchronous>, transform_indices = @transform_4, window_bounds = array<i64: 32, 128>}, {pipeline_mode = #tpu.pipeline_mode<synchronous>, transform_indices = @transform_5, window_bounds = array<i64: 32, 128>}, {pipeline_mode = #tpu.pipeline_mode<synchronous>, transform_indices = @transform_6, window_bounds = array<i64: 1, 128>}, {pipeline_mode = #tpu.pipeline_mode<synchronous>, transform_indices = @transform_7, window_bounds = array<i64: 8, 256>}, {pipeline_mode = #tpu.pipeline_mode<synchronous>, transform_indices = @transform_8, window_bounds = array<i64: 2, 8, 32>}, {pipeline_mode = #tpu.pipeline_mode<synchronous>, transform_indices = @transform_9, window_bounds = array<i64: 2, 8, 32>}]} {
    %c0 = arith.constant 0 : index
    %c0_0 = arith.constant 0 : index
    %0 = vector.load %arg2[%c0, %c0_0] : memref<32x128xbf16, #tpu.memory_space<vmem>>, vector<32x128xbf16>
    %c0_1 = arith.constant 0 : index
    %c0_2 = arith.constant 0 : index
    %1 = vector.load %arg3[%c0_1, %c0_2] : memref<32x128xbf16, #tpu.memory_space<vmem>>, vector<32x128xbf16>
    %c0_3 = arith.constant 0 : index
    %c0_4 = arith.constant 0 : index
    %2 = vector.load %arg5[%c0_3, %c0_4] : memref<32x128xbf16, #tpu.memory_space<vmem>>, vector<32x128xbf16>
    %c0_5 = arith.constant 0 : index
    %c0_6 = arith.constant 0 : index
    %3 = vector.load %arg6[%c0_5, %c0_6] : memref<32x128xbf16, #tpu.memory_space<vmem>>, vector<32x128xbf16>
    %c0_7 = arith.constant 0 : index
    %c0_8 = arith.constant 0 : index
    %4 = vector.load %arg4[%c0_7, %c0_8] : memref<1x128xf32, #tpu.memory_space<vmem>>, vector<1x128xf32>
    %c0_9 = arith.constant 0 : index
    %c0_10 = arith.constant 0 : index
    %5 = vector.load %arg7[%c0_9, %c0_10] : memref<1x128xf32, #tpu.memory_space<vmem>>, vector<1x128xf32>
    %c0_11 = arith.constant 0 : index
    %c0_12 = arith.constant 0 : index
    %6 = vector.load %arg1[%c0_11, %c0_12] : memref<64x32xf32, #tpu.memory_space<vmem>>, vector<64x32xf32>
    %7 = arith.truncf %6 : vector<64x32xf32> to vector<64x32xbf16>
    %cst = arith.constant dense<0.000000e+00> : vector<64x128xf32>
    %8 = tpu.matmul %7, %0, %cst {dimension_numbers = #tpu.dot_dimension_numbers<[1], [0], [0], [1], [0, 0, 1, 1], [], []>} : vector<64x32xbf16>, vector<32x128xbf16>, vector<64x128xf32> -> vector<64x128xf32>
    %9 = vector.broadcast %4 : vector<1x128xf32> to vector<64x128xf32>
    %10 = arith.addf %8, %9 : vector<64x128xf32>
    %cst_13 = arith.constant 0.000000e+00 : f32
    %11 = vector.broadcast %cst_13 : f32 to vector<8x32xf32>
    %12 = vector.extract_strided_slice %10 {offsets = [0, 0], sizes = [8, 128], strides = [1, 1]} : vector<64x128xf32> to vector<8x128xf32>
    %13 = arith.truncf %11 : vector<8x32xf32> to vector<8x32xbf16>
    %cst_14 = arith.constant dense<0.000000e+00> : vector<8x128xf32>
    %14 = tpu.matmul %13, %1, %cst_14 {dimension_numbers = #tpu.dot_dimension_numbers<[1], [0], [0], [1], [0, 0, 1, 1], [], []>} : vector<8x32xbf16>, vector<32x128xbf16>, vector<8x128xf32> -> vector<8x128xf32>
    %15 = arith.addf %12, %14 : vector<8x128xf32>
    %16 = arith.negf %15 : vector<8x128xf32>
    %17 = math.exp %16 : vector<8x128xf32>
    %cst_15 = arith.constant 1.000000e+00 : f32
    %18 = vector.broadcast %cst_15 : f32 to vector<8x128xf32>
    %19 = arith.addf %18, %17 : vector<8x128xf32>
    %20 = arith.divf %18, %19 : vector<8x128xf32>
    %21 = math.tanh %15 : vector<8x128xf32>
    %22 = vector.extract_strided_slice %20 {offsets = [0, 0], sizes = [8, 32], strides = [1, 1]} : vector<8x128xf32> to vector<8x32xf32>
    %23 = vector.extract_strided_slice %20 {offsets = [0, 32], sizes = [8, 32], strides = [1, 1]} : vector<8x128xf32> to vector<8x32xf32>
    %24 = vector.extract_strided_slice %21 {offsets = [0, 64], sizes = [8, 32], strides = [1, 1]} : vector<8x128xf32> to vector<8x32xf32>
    %25 = vector.extract_strided_slice %20 {offsets = [0, 96], sizes = [8, 32], strides = [1, 1]} : vector<8x128xf32> to vector<8x32xf32>
    %26 = arith.mulf %23, %11 : vector<8x32xf32>
    %27 = arith.mulf %22, %24 : vector<8x32xf32>
    %28 = arith.addf %26, %27 : vector<8x32xf32>
    %29 = math.tanh %28 : vector<8x32xf32>
    %30 = arith.mulf %25, %29 : vector<8x32xf32>
    %31 = vector.extract_strided_slice %10 {offsets = [8, 0], sizes = [8, 128], strides = [1, 1]} : vector<64x128xf32> to vector<8x128xf32>
    %32 = arith.truncf %30 : vector<8x32xf32> to vector<8x32xbf16>
    %cst_16 = arith.constant dense<0.000000e+00> : vector<8x128xf32>
    %33 = tpu.matmul %32, %1, %cst_16 {dimension_numbers = #tpu.dot_dimension_numbers<[1], [0], [0], [1], [0, 0, 1, 1], [], []>} : vector<8x32xbf16>, vector<32x128xbf16>, vector<8x128xf32> -> vector<8x128xf32>
    %34 = arith.addf %31, %33 : vector<8x128xf32>
    %35 = arith.negf %34 : vector<8x128xf32>
    %36 = math.exp %35 : vector<8x128xf32>
    %cst_17 = arith.constant 1.000000e+00 : f32
    %37 = vector.broadcast %cst_17 : f32 to vector<8x128xf32>
    %38 = arith.addf %37, %36 : vector<8x128xf32>
    %39 = arith.divf %37, %38 : vector<8x128xf32>
    %40 = math.tanh %34 : vector<8x128xf32>
    %41 = vector.extract_strided_slice %39 {offsets = [0, 0], sizes = [8, 32], strides = [1, 1]} : vector<8x128xf32> to vector<8x32xf32>
    %42 = vector.extract_strided_slice %39 {offsets = [0, 32], sizes = [8, 32], strides = [1, 1]} : vector<8x128xf32> to vector<8x32xf32>
    %43 = vector.extract_strided_slice %40 {offsets = [0, 64], sizes = [8, 32], strides = [1, 1]} : vector<8x128xf32> to vector<8x32xf32>
    %44 = vector.extract_strided_slice %39 {offsets = [0, 96], sizes = [8, 32], strides = [1, 1]} : vector<8x128xf32> to vector<8x32xf32>
    %45 = arith.mulf %42, %28 : vector<8x32xf32>
    %46 = arith.mulf %41, %43 : vector<8x32xf32>
    %47 = arith.addf %45, %46 : vector<8x32xf32>
    %48 = math.tanh %47 : vector<8x32xf32>
    %49 = arith.mulf %44, %48 : vector<8x32xf32>
    %50 = arith.truncf %30 : vector<8x32xf32> to vector<8x32xbf16>
    %cst_18 = arith.constant dense<0.000000e+00> : vector<8x128xf32>
    %51 = tpu.matmul %50, %2, %cst_18 {dimension_numbers = #tpu.dot_dimension_numbers<[1], [0], [0], [1], [0, 0, 1, 1], [], []>} : vector<8x32xbf16>, vector<32x128xbf16>, vector<8x128xf32> -> vector<8x128xf32>
    %52 = vector.broadcast %5 : vector<1x128xf32> to vector<8x128xf32>
    %53 = arith.addf %51, %52 : vector<8x128xf32>
    %54 = arith.truncf %11 : vector<8x32xf32> to vector<8x32xbf16>
    %cst_19 = arith.constant dense<0.000000e+00> : vector<8x128xf32>
    %55 = tpu.matmul %54, %3, %cst_19 {dimension_numbers = #tpu.dot_dimension_numbers<[1], [0], [0], [1], [0, 0, 1, 1], [], []>} : vector<8x32xbf16>, vector<32x128xbf16>, vector<8x128xf32> -> vector<8x128xf32>
    %56 = arith.addf %53, %55 : vector<8x128xf32>
    %57 = arith.negf %56 : vector<8x128xf32>
    %58 = math.exp %57 : vector<8x128xf32>
    %cst_20 = arith.constant 1.000000e+00 : f32
    %59 = vector.broadcast %cst_20 : f32 to vector<8x128xf32>
    %60 = arith.addf %59, %58 : vector<8x128xf32>
    %61 = arith.divf %59, %60 : vector<8x128xf32>
    %62 = math.tanh %56 : vector<8x128xf32>
    %63 = vector.extract_strided_slice %61 {offsets = [0, 0], sizes = [8, 32], strides = [1, 1]} : vector<8x128xf32> to vector<8x32xf32>
    %64 = vector.extract_strided_slice %61 {offsets = [0, 32], sizes = [8, 32], strides = [1, 1]} : vector<8x128xf32> to vector<8x32xf32>
    %65 = vector.extract_strided_slice %62 {offsets = [0, 64], sizes = [8, 32], strides = [1, 1]} : vector<8x128xf32> to vector<8x32xf32>
    %66 = vector.extract_strided_slice %61 {offsets = [0, 96], sizes = [8, 32], strides = [1, 1]} : vector<8x128xf32> to vector<8x32xf32>
    %67 = arith.mulf %64, %11 : vector<8x32xf32>
    %68 = arith.mulf %63, %65 : vector<8x32xf32>
    %69 = arith.addf %67, %68 : vector<8x32xf32>
    %70 = math.tanh %69 : vector<8x32xf32>
    %71 = arith.mulf %66, %70 : vector<8x32xf32>
    %72 = vector.extract_strided_slice %10 {offsets = [16, 0], sizes = [8, 128], strides = [1, 1]} : vector<64x128xf32> to vector<8x128xf32>
    %73 = arith.truncf %49 : vector<8x32xf32> to vector<8x32xbf16>
    %cst_21 = arith.constant dense<0.000000e+00> : vector<8x128xf32>
    %74 = tpu.matmul %73, %1, %cst_21 {dimension_numbers = #tpu.dot_dimension_numbers<[1], [0], [0], [1], [0, 0, 1, 1], [], []>} : vector<8x32xbf16>, vector<32x128xbf16>, vector<8x128xf32> -> vector<8x128xf32>
    %75 = arith.addf %72, %74 : vector<8x128xf32>
    %76 = arith.negf %75 : vector<8x128xf32>
    %77 = math.exp %76 : vector<8x128xf32>
    %cst_22 = arith.constant 1.000000e+00 : f32
    %78 = vector.broadcast %cst_22 : f32 to vector<8x128xf32>
    %79 = arith.addf %78, %77 : vector<8x128xf32>
    %80 = arith.divf %78, %79 : vector<8x128xf32>
    %81 = math.tanh %75 : vector<8x128xf32>
    %82 = vector.extract_strided_slice %80 {offsets = [0, 0], sizes = [8, 32], strides = [1, 1]} : vector<8x128xf32> to vector<8x32xf32>
    %83 = vector.extract_strided_slice %80 {offsets = [0, 32], sizes = [8, 32], strides = [1, 1]} : vector<8x128xf32> to vector<8x32xf32>
    %84 = vector.extract_strided_slice %81 {offsets = [0, 64], sizes = [8, 32], strides = [1, 1]} : vector<8x128xf32> to vector<8x32xf32>
    %85 = vector.extract_strided_slice %80 {offsets = [0, 96], sizes = [8, 32], strides = [1, 1]} : vector<8x128xf32> to vector<8x32xf32>
    %86 = arith.mulf %83, %47 : vector<8x32xf32>
    %87 = arith.mulf %82, %84 : vector<8x32xf32>
    %88 = arith.addf %86, %87 : vector<8x32xf32>
    %89 = math.tanh %88 : vector<8x32xf32>
    %90 = arith.mulf %85, %89 : vector<8x32xf32>
    %91 = arith.truncf %49 : vector<8x32xf32> to vector<8x32xbf16>
    %cst_23 = arith.constant dense<0.000000e+00> : vector<8x128xf32>
    %92 = tpu.matmul %91, %2, %cst_23 {dimension_numbers = #tpu.dot_dimension_numbers<[1], [0], [0], [1], [0, 0, 1, 1], [], []>} : vector<8x32xbf16>, vector<32x128xbf16>, vector<8x128xf32> -> vector<8x128xf32>
    %93 = vector.broadcast %5 : vector<1x128xf32> to vector<8x128xf32>
    %94 = arith.addf %92, %93 : vector<8x128xf32>
    %95 = arith.truncf %71 : vector<8x32xf32> to vector<8x32xbf16>
    %cst_24 = arith.constant dense<0.000000e+00> : vector<8x128xf32>
    %96 = tpu.matmul %95, %3, %cst_24 {dimension_numbers = #tpu.dot_dimension_numbers<[1], [0], [0], [1], [0, 0, 1, 1], [], []>} : vector<8x32xbf16>, vector<32x128xbf16>, vector<8x128xf32> -> vector<8x128xf32>
    %97 = arith.addf %94, %96 : vector<8x128xf32>
    %98 = arith.negf %97 : vector<8x128xf32>
    %99 = math.exp %98 : vector<8x128xf32>
    %cst_25 = arith.constant 1.000000e+00 : f32
    %100 = vector.broadcast %cst_25 : f32 to vector<8x128xf32>
    %101 = arith.addf %100, %99 : vector<8x128xf32>
    %102 = arith.divf %100, %101 : vector<8x128xf32>
    %103 = math.tanh %97 : vector<8x128xf32>
    %104 = vector.extract_strided_slice %102 {offsets = [0, 0], sizes = [8, 32], strides = [1, 1]} : vector<8x128xf32> to vector<8x32xf32>
    %105 = vector.extract_strided_slice %102 {offsets = [0, 32], sizes = [8, 32], strides = [1, 1]} : vector<8x128xf32> to vector<8x32xf32>
    %106 = vector.extract_strided_slice %103 {offsets = [0, 64], sizes = [8, 32], strides = [1, 1]} : vector<8x128xf32> to vector<8x32xf32>
    %107 = vector.extract_strided_slice %102 {offsets = [0, 96], sizes = [8, 32], strides = [1, 1]} : vector<8x128xf32> to vector<8x32xf32>
    %108 = arith.mulf %105, %69 : vector<8x32xf32>
    %109 = arith.mulf %104, %106 : vector<8x32xf32>
    %110 = arith.addf %108, %109 : vector<8x32xf32>
    %111 = math.tanh %110 : vector<8x32xf32>
    %112 = arith.mulf %107, %111 : vector<8x32xf32>
    %113 = vector.extract_strided_slice %10 {offsets = [24, 0], sizes = [8, 128], strides = [1, 1]} : vector<64x128xf32> to vector<8x128xf32>
    %114 = arith.truncf %90 : vector<8x32xf32> to vector<8x32xbf16>
    %cst_26 = arith.constant dense<0.000000e+00> : vector<8x128xf32>
    %115 = tpu.matmul %114, %1, %cst_26 {dimension_numbers = #tpu.dot_dimension_numbers<[1], [0], [0], [1], [0, 0, 1, 1], [], []>} : vector<8x32xbf16>, vector<32x128xbf16>, vector<8x128xf32> -> vector<8x128xf32>
    %116 = arith.addf %113, %115 : vector<8x128xf32>
    %117 = arith.negf %116 : vector<8x128xf32>
    %118 = math.exp %117 : vector<8x128xf32>
    %cst_27 = arith.constant 1.000000e+00 : f32
    %119 = vector.broadcast %cst_27 : f32 to vector<8x128xf32>
    %120 = arith.addf %119, %118 : vector<8x128xf32>
    %121 = arith.divf %119, %120 : vector<8x128xf32>
    %122 = math.tanh %116 : vector<8x128xf32>
    %123 = vector.extract_strided_slice %121 {offsets = [0, 0], sizes = [8, 32], strides = [1, 1]} : vector<8x128xf32> to vector<8x32xf32>
    %124 = vector.extract_strided_slice %121 {offsets = [0, 32], sizes = [8, 32], strides = [1, 1]} : vector<8x128xf32> to vector<8x32xf32>
    %125 = vector.extract_strided_slice %122 {offsets = [0, 64], sizes = [8, 32], strides = [1, 1]} : vector<8x128xf32> to vector<8x32xf32>
    %126 = vector.extract_strided_slice %121 {offsets = [0, 96], sizes = [8, 32], strides = [1, 1]} : vector<8x128xf32> to vector<8x32xf32>
    %127 = arith.mulf %124, %88 : vector<8x32xf32>
    %128 = arith.mulf %123, %125 : vector<8x32xf32>
    %129 = arith.addf %127, %128 : vector<8x32xf32>
    %130 = math.tanh %129 : vector<8x32xf32>
    %131 = arith.mulf %126, %130 : vector<8x32xf32>
    %132 = arith.truncf %90 : vector<8x32xf32> to vector<8x32xbf16>
    %cst_28 = arith.constant dense<0.000000e+00> : vector<8x128xf32>
    %133 = tpu.matmul %132, %2, %cst_28 {dimension_numbers = #tpu.dot_dimension_numbers<[1], [0], [0], [1], [0, 0, 1, 1], [], []>} : vector<8x32xbf16>, vector<32x128xbf16>, vector<8x128xf32> -> vector<8x128xf32>
    %134 = vector.broadcast %5 : vector<1x128xf32> to vector<8x128xf32>
    %135 = arith.addf %133, %134 : vector<8x128xf32>
    %136 = arith.truncf %112 : vector<8x32xf32> to vector<8x32xbf16>
    %cst_29 = arith.constant dense<0.000000e+00> : vector<8x128xf32>
    %137 = tpu.matmul %136, %3, %cst_29 {dimension_numbers = #tpu.dot_dimension_numbers<[1], [0], [0], [1], [0, 0, 1, 1], [], []>} : vector<8x32xbf16>, vector<32x128xbf16>, vector<8x128xf32> -> vector<8x128xf32>
    %138 = arith.addf %135, %137 : vector<8x128xf32>
    %139 = arith.negf %138 : vector<8x128xf32>
    %140 = math.exp %139 : vector<8x128xf32>
    %cst_30 = arith.constant 1.000000e+00 : f32
    %141 = vector.broadcast %cst_30 : f32 to vector<8x128xf32>
    %142 = arith.addf %141, %140 : vector<8x128xf32>
    %143 = arith.divf %141, %142 : vector<8x128xf32>
    %144 = math.tanh %138 : vector<8x128xf32>
    %145 = vector.extract_strided_slice %143 {offsets = [0, 0], sizes = [8, 32], strides = [1, 1]} : vector<8x128xf32> to vector<8x32xf32>
    %146 = vector.extract_strided_slice %143 {offsets = [0, 32], sizes = [8, 32], strides = [1, 1]} : vector<8x128xf32> to vector<8x32xf32>
    %147 = vector.extract_strided_slice %144 {offsets = [0, 64], sizes = [8, 32], strides = [1, 1]} : vector<8x128xf32> to vector<8x32xf32>
    %148 = vector.extract_strided_slice %143 {offsets = [0, 96], sizes = [8, 32], strides = [1, 1]} : vector<8x128xf32> to vector<8x32xf32>
    %149 = arith.mulf %146, %110 : vector<8x32xf32>
    %150 = arith.mulf %145, %147 : vector<8x32xf32>
    %151 = arith.addf %149, %150 : vector<8x32xf32>
    %152 = math.tanh %151 : vector<8x32xf32>
    %153 = arith.mulf %148, %152 : vector<8x32xf32>
    %154 = vector.extract_strided_slice %10 {offsets = [32, 0], sizes = [8, 128], strides = [1, 1]} : vector<64x128xf32> to vector<8x128xf32>
    %155 = arith.truncf %131 : vector<8x32xf32> to vector<8x32xbf16>
    %cst_31 = arith.constant dense<0.000000e+00> : vector<8x128xf32>
    %156 = tpu.matmul %155, %1, %cst_31 {dimension_numbers = #tpu.dot_dimension_numbers<[1], [0], [0], [1], [0, 0, 1, 1], [], []>} : vector<8x32xbf16>, vector<32x128xbf16>, vector<8x128xf32> -> vector<8x128xf32>
    %157 = arith.addf %154, %156 : vector<8x128xf32>
    %158 = arith.negf %157 : vector<8x128xf32>
    %159 = math.exp %158 : vector<8x128xf32>
    %cst_32 = arith.constant 1.000000e+00 : f32
    %160 = vector.broadcast %cst_32 : f32 to vector<8x128xf32>
    %161 = arith.addf %160, %159 : vector<8x128xf32>
    %162 = arith.divf %160, %161 : vector<8x128xf32>
    %163 = math.tanh %157 : vector<8x128xf32>
    %164 = vector.extract_strided_slice %162 {offsets = [0, 0], sizes = [8, 32], strides = [1, 1]} : vector<8x128xf32> to vector<8x32xf32>
    %165 = vector.extract_strided_slice %162 {offsets = [0, 32], sizes = [8, 32], strides = [1, 1]} : vector<8x128xf32> to vector<8x32xf32>
    %166 = vector.extract_strided_slice %163 {offsets = [0, 64], sizes = [8, 32], strides = [1, 1]} : vector<8x128xf32> to vector<8x32xf32>
    %167 = vector.extract_strided_slice %162 {offsets = [0, 96], sizes = [8, 32], strides = [1, 1]} : vector<8x128xf32> to vector<8x32xf32>
    %168 = arith.mulf %165, %129 : vector<8x32xf32>
    %169 = arith.mulf %164, %166 : vector<8x32xf32>
    %170 = arith.addf %168, %169 : vector<8x32xf32>
    %171 = math.tanh %170 : vector<8x32xf32>
    %172 = arith.mulf %167, %171 : vector<8x32xf32>
    %173 = arith.truncf %131 : vector<8x32xf32> to vector<8x32xbf16>
    %cst_33 = arith.constant dense<0.000000e+00> : vector<8x128xf32>
    %174 = tpu.matmul %173, %2, %cst_33 {dimension_numbers = #tpu.dot_dimension_numbers<[1], [0], [0], [1], [0, 0, 1, 1], [], []>} : vector<8x32xbf16>, vector<32x128xbf16>, vector<8x128xf32> -> vector<8x128xf32>
    %175 = vector.broadcast %5 : vector<1x128xf32> to vector<8x128xf32>
    %176 = arith.addf %174, %175 : vector<8x128xf32>
    %177 = arith.truncf %153 : vector<8x32xf32> to vector<8x32xbf16>
    %cst_34 = arith.constant dense<0.000000e+00> : vector<8x128xf32>
    %178 = tpu.matmul %177, %3, %cst_34 {dimension_numbers = #tpu.dot_dimension_numbers<[1], [0], [0], [1], [0, 0, 1, 1], [], []>} : vector<8x32xbf16>, vector<32x128xbf16>, vector<8x128xf32> -> vector<8x128xf32>
    %179 = arith.addf %176, %178 : vector<8x128xf32>
    %180 = arith.negf %179 : vector<8x128xf32>
    %181 = math.exp %180 : vector<8x128xf32>
    %cst_35 = arith.constant 1.000000e+00 : f32
    %182 = vector.broadcast %cst_35 : f32 to vector<8x128xf32>
    %183 = arith.addf %182, %181 : vector<8x128xf32>
    %184 = arith.divf %182, %183 : vector<8x128xf32>
    %185 = math.tanh %179 : vector<8x128xf32>
    %186 = vector.extract_strided_slice %184 {offsets = [0, 0], sizes = [8, 32], strides = [1, 1]} : vector<8x128xf32> to vector<8x32xf32>
    %187 = vector.extract_strided_slice %184 {offsets = [0, 32], sizes = [8, 32], strides = [1, 1]} : vector<8x128xf32> to vector<8x32xf32>
    %188 = vector.extract_strided_slice %185 {offsets = [0, 64], sizes = [8, 32], strides = [1, 1]} : vector<8x128xf32> to vector<8x32xf32>
    %189 = vector.extract_strided_slice %184 {offsets = [0, 96], sizes = [8, 32], strides = [1, 1]} : vector<8x128xf32> to vector<8x32xf32>
    %190 = arith.mulf %187, %151 : vector<8x32xf32>
    %191 = arith.mulf %186, %188 : vector<8x32xf32>
    %192 = arith.addf %190, %191 : vector<8x32xf32>
    %193 = math.tanh %192 : vector<8x32xf32>
    %194 = arith.mulf %189, %193 : vector<8x32xf32>
    %195 = vector.extract_strided_slice %10 {offsets = [40, 0], sizes = [8, 128], strides = [1, 1]} : vector<64x128xf32> to vector<8x128xf32>
    %196 = arith.truncf %172 : vector<8x32xf32> to vector<8x32xbf16>
    %cst_36 = arith.constant dense<0.000000e+00> : vector<8x128xf32>
    %197 = tpu.matmul %196, %1, %cst_36 {dimension_numbers = #tpu.dot_dimension_numbers<[1], [0], [0], [1], [0, 0, 1, 1], [], []>} : vector<8x32xbf16>, vector<32x128xbf16>, vector<8x128xf32> -> vector<8x128xf32>
    %198 = arith.addf %195, %197 : vector<8x128xf32>
    %199 = arith.negf %198 : vector<8x128xf32>
    %200 = math.exp %199 : vector<8x128xf32>
    %cst_37 = arith.constant 1.000000e+00 : f32
    %201 = vector.broadcast %cst_37 : f32 to vector<8x128xf32>
    %202 = arith.addf %201, %200 : vector<8x128xf32>
    %203 = arith.divf %201, %202 : vector<8x128xf32>
    %204 = math.tanh %198 : vector<8x128xf32>
    %205 = vector.extract_strided_slice %203 {offsets = [0, 0], sizes = [8, 32], strides = [1, 1]} : vector<8x128xf32> to vector<8x32xf32>
    %206 = vector.extract_strided_slice %203 {offsets = [0, 32], sizes = [8, 32], strides = [1, 1]} : vector<8x128xf32> to vector<8x32xf32>
    %207 = vector.extract_strided_slice %204 {offsets = [0, 64], sizes = [8, 32], strides = [1, 1]} : vector<8x128xf32> to vector<8x32xf32>
    %208 = vector.extract_strided_slice %203 {offsets = [0, 96], sizes = [8, 32], strides = [1, 1]} : vector<8x128xf32> to vector<8x32xf32>
    %209 = arith.mulf %206, %170 : vector<8x32xf32>
    %210 = arith.mulf %205, %207 : vector<8x32xf32>
    %211 = arith.addf %209, %210 : vector<8x32xf32>
    %212 = math.tanh %211 : vector<8x32xf32>
    %213 = arith.mulf %208, %212 : vector<8x32xf32>
    %214 = arith.truncf %172 : vector<8x32xf32> to vector<8x32xbf16>
    %cst_38 = arith.constant dense<0.000000e+00> : vector<8x128xf32>
    %215 = tpu.matmul %214, %2, %cst_38 {dimension_numbers = #tpu.dot_dimension_numbers<[1], [0], [0], [1], [0, 0, 1, 1], [], []>} : vector<8x32xbf16>, vector<32x128xbf16>, vector<8x128xf32> -> vector<8x128xf32>
    %216 = vector.broadcast %5 : vector<1x128xf32> to vector<8x128xf32>
    %217 = arith.addf %215, %216 : vector<8x128xf32>
    %218 = arith.truncf %194 : vector<8x32xf32> to vector<8x32xbf16>
    %cst_39 = arith.constant dense<0.000000e+00> : vector<8x128xf32>
    %219 = tpu.matmul %218, %3, %cst_39 {dimension_numbers = #tpu.dot_dimension_numbers<[1], [0], [0], [1], [0, 0, 1, 1], [], []>} : vector<8x32xbf16>, vector<32x128xbf16>, vector<8x128xf32> -> vector<8x128xf32>
    %220 = arith.addf %217, %219 : vector<8x128xf32>
    %221 = arith.negf %220 : vector<8x128xf32>
    %222 = math.exp %221 : vector<8x128xf32>
    %cst_40 = arith.constant 1.000000e+00 : f32
    %223 = vector.broadcast %cst_40 : f32 to vector<8x128xf32>
    %224 = arith.addf %223, %222 : vector<8x128xf32>
    %225 = arith.divf %223, %224 : vector<8x128xf32>
    %226 = math.tanh %220 : vector<8x128xf32>
    %227 = vector.extract_strided_slice %225 {offsets = [0, 0], sizes = [8, 32], strides = [1, 1]} : vector<8x128xf32> to vector<8x32xf32>
    %228 = vector.extract_strided_slice %225 {offsets = [0, 32], sizes = [8, 32], strides = [1, 1]} : vector<8x128xf32> to vector<8x32xf32>
    %229 = vector.extract_strided_slice %226 {offsets = [0, 64], sizes = [8, 32], strides = [1, 1]} : vector<8x128xf32> to vector<8x32xf32>
    %230 = vector.extract_strided_slice %225 {offsets = [0, 96], sizes = [8, 32], strides = [1, 1]} : vector<8x128xf32> to vector<8x32xf32>
    %231 = arith.mulf %228, %192 : vector<8x32xf32>
    %232 = arith.mulf %227, %229 : vector<8x32xf32>
    %233 = arith.addf %231, %232 : vector<8x32xf32>
    %234 = math.tanh %233 : vector<8x32xf32>
    %235 = arith.mulf %230, %234 : vector<8x32xf32>
    %236 = vector.extract_strided_slice %10 {offsets = [48, 0], sizes = [8, 128], strides = [1, 1]} : vector<64x128xf32> to vector<8x128xf32>
    %237 = arith.truncf %213 : vector<8x32xf32> to vector<8x32xbf16>
    %cst_41 = arith.constant dense<0.000000e+00> : vector<8x128xf32>
    %238 = tpu.matmul %237, %1, %cst_41 {dimension_numbers = #tpu.dot_dimension_numbers<[1], [0], [0], [1], [0, 0, 1, 1], [], []>} : vector<8x32xbf16>, vector<32x128xbf16>, vector<8x128xf32> -> vector<8x128xf32>
    %239 = arith.addf %236, %238 : vector<8x128xf32>
    %240 = arith.negf %239 : vector<8x128xf32>
    %241 = math.exp %240 : vector<8x128xf32>
    %cst_42 = arith.constant 1.000000e+00 : f32
    %242 = vector.broadcast %cst_42 : f32 to vector<8x128xf32>
    %243 = arith.addf %242, %241 : vector<8x128xf32>
    %244 = arith.divf %242, %243 : vector<8x128xf32>
    %245 = math.tanh %239 : vector<8x128xf32>
    %246 = vector.extract_strided_slice %244 {offsets = [0, 0], sizes = [8, 32], strides = [1, 1]} : vector<8x128xf32> to vector<8x32xf32>
    %247 = vector.extract_strided_slice %244 {offsets = [0, 32], sizes = [8, 32], strides = [1, 1]} : vector<8x128xf32> to vector<8x32xf32>
    %248 = vector.extract_strided_slice %245 {offsets = [0, 64], sizes = [8, 32], strides = [1, 1]} : vector<8x128xf32> to vector<8x32xf32>
    %249 = vector.extract_strided_slice %244 {offsets = [0, 96], sizes = [8, 32], strides = [1, 1]} : vector<8x128xf32> to vector<8x32xf32>
    %250 = arith.mulf %247, %211 : vector<8x32xf32>
    %251 = arith.mulf %246, %248 : vector<8x32xf32>
    %252 = arith.addf %250, %251 : vector<8x32xf32>
    %253 = math.tanh %252 : vector<8x32xf32>
    %254 = arith.mulf %249, %253 : vector<8x32xf32>
    %255 = arith.truncf %213 : vector<8x32xf32> to vector<8x32xbf16>
    %cst_43 = arith.constant dense<0.000000e+00> : vector<8x128xf32>
    %256 = tpu.matmul %255, %2, %cst_43 {dimension_numbers = #tpu.dot_dimension_numbers<[1], [0], [0], [1], [0, 0, 1, 1], [], []>} : vector<8x32xbf16>, vector<32x128xbf16>, vector<8x128xf32> -> vector<8x128xf32>
    %257 = vector.broadcast %5 : vector<1x128xf32> to vector<8x128xf32>
    %258 = arith.addf %256, %257 : vector<8x128xf32>
    %259 = arith.truncf %235 : vector<8x32xf32> to vector<8x32xbf16>
    %cst_44 = arith.constant dense<0.000000e+00> : vector<8x128xf32>
    %260 = tpu.matmul %259, %3, %cst_44 {dimension_numbers = #tpu.dot_dimension_numbers<[1], [0], [0], [1], [0, 0, 1, 1], [], []>} : vector<8x32xbf16>, vector<32x128xbf16>, vector<8x128xf32> -> vector<8x128xf32>
    %261 = arith.addf %258, %260 : vector<8x128xf32>
    %262 = arith.negf %261 : vector<8x128xf32>
    %263 = math.exp %262 : vector<8x128xf32>
    %cst_45 = arith.constant 1.000000e+00 : f32
    %264 = vector.broadcast %cst_45 : f32 to vector<8x128xf32>
    %265 = arith.addf %264, %263 : vector<8x128xf32>
    %266 = arith.divf %264, %265 : vector<8x128xf32>
    %267 = math.tanh %261 : vector<8x128xf32>
    %268 = vector.extract_strided_slice %266 {offsets = [0, 0], sizes = [8, 32], strides = [1, 1]} : vector<8x128xf32> to vector<8x32xf32>
    %269 = vector.extract_strided_slice %266 {offsets = [0, 32], sizes = [8, 32], strides = [1, 1]} : vector<8x128xf32> to vector<8x32xf32>
    %270 = vector.extract_strided_slice %267 {offsets = [0, 64], sizes = [8, 32], strides = [1, 1]} : vector<8x128xf32> to vector<8x32xf32>
    %271 = vector.extract_strided_slice %266 {offsets = [0, 96], sizes = [8, 32], strides = [1, 1]} : vector<8x128xf32> to vector<8x32xf32>
    %272 = arith.mulf %269, %233 : vector<8x32xf32>
    %273 = arith.mulf %268, %270 : vector<8x32xf32>
    %274 = arith.addf %272, %273 : vector<8x32xf32>
    %275 = math.tanh %274 : vector<8x32xf32>
    %276 = arith.mulf %271, %275 : vector<8x32xf32>
    %277 = vector.extract_strided_slice %10 {offsets = [56, 0], sizes = [8, 128], strides = [1, 1]} : vector<64x128xf32> to vector<8x128xf32>
    %278 = arith.truncf %254 : vector<8x32xf32> to vector<8x32xbf16>
    %cst_46 = arith.constant dense<0.000000e+00> : vector<8x128xf32>
    %279 = tpu.matmul %278, %1, %cst_46 {dimension_numbers = #tpu.dot_dimension_numbers<[1], [0], [0], [1], [0, 0, 1, 1], [], []>} : vector<8x32xbf16>, vector<32x128xbf16>, vector<8x128xf32> -> vector<8x128xf32>
    %280 = arith.addf %277, %279 : vector<8x128xf32>
    %281 = arith.negf %280 : vector<8x128xf32>
    %282 = math.exp %281 : vector<8x128xf32>
    %cst_47 = arith.constant 1.000000e+00 : f32
    %283 = vector.broadcast %cst_47 : f32 to vector<8x128xf32>
    %284 = arith.addf %283, %282 : vector<8x128xf32>
    %285 = arith.divf %283, %284 : vector<8x128xf32>
    %286 = math.tanh %280 : vector<8x128xf32>
    %287 = vector.extract_strided_slice %285 {offsets = [0, 0], sizes = [8, 32], strides = [1, 1]} : vector<8x128xf32> to vector<8x32xf32>
    %288 = vector.extract_strided_slice %285 {offsets = [0, 32], sizes = [8, 32], strides = [1, 1]} : vector<8x128xf32> to vector<8x32xf32>
    %289 = vector.extract_strided_slice %286 {offsets = [0, 64], sizes = [8, 32], strides = [1, 1]} : vector<8x128xf32> to vector<8x32xf32>
    %290 = vector.extract_strided_slice %285 {offsets = [0, 96], sizes = [8, 32], strides = [1, 1]} : vector<8x128xf32> to vector<8x32xf32>
    %291 = arith.mulf %288, %252 : vector<8x32xf32>
    %292 = arith.mulf %287, %289 : vector<8x32xf32>
    %293 = arith.addf %291, %292 : vector<8x32xf32>
    %294 = math.tanh %293 : vector<8x32xf32>
    %295 = arith.mulf %290, %294 : vector<8x32xf32>
    %296 = arith.truncf %254 : vector<8x32xf32> to vector<8x32xbf16>
    %cst_48 = arith.constant dense<0.000000e+00> : vector<8x128xf32>
    %297 = tpu.matmul %296, %2, %cst_48 {dimension_numbers = #tpu.dot_dimension_numbers<[1], [0], [0], [1], [0, 0, 1, 1], [], []>} : vector<8x32xbf16>, vector<32x128xbf16>, vector<8x128xf32> -> vector<8x128xf32>
    %298 = vector.broadcast %5 : vector<1x128xf32> to vector<8x128xf32>
    %299 = arith.addf %297, %298 : vector<8x128xf32>
    %300 = arith.truncf %276 : vector<8x32xf32> to vector<8x32xbf16>
    %cst_49 = arith.constant dense<0.000000e+00> : vector<8x128xf32>
    %301 = tpu.matmul %300, %3, %cst_49 {dimension_numbers = #tpu.dot_dimension_numbers<[1], [0], [0], [1], [0, 0, 1, 1], [], []>} : vector<8x32xbf16>, vector<32x128xbf16>, vector<8x128xf32> -> vector<8x128xf32>
    %302 = arith.addf %299, %301 : vector<8x128xf32>
    %303 = arith.negf %302 : vector<8x128xf32>
    %304 = math.exp %303 : vector<8x128xf32>
    %cst_50 = arith.constant 1.000000e+00 : f32
    %305 = vector.broadcast %cst_50 : f32 to vector<8x128xf32>
    %306 = arith.addf %305, %304 : vector<8x128xf32>
    %307 = arith.divf %305, %306 : vector<8x128xf32>
    %308 = math.tanh %302 : vector<8x128xf32>
    %309 = vector.extract_strided_slice %307 {offsets = [0, 0], sizes = [8, 32], strides = [1, 1]} : vector<8x128xf32> to vector<8x32xf32>
    %310 = vector.extract_strided_slice %307 {offsets = [0, 32], sizes = [8, 32], strides = [1, 1]} : vector<8x128xf32> to vector<8x32xf32>
    %311 = vector.extract_strided_slice %308 {offsets = [0, 64], sizes = [8, 32], strides = [1, 1]} : vector<8x128xf32> to vector<8x32xf32>
    %312 = vector.extract_strided_slice %307 {offsets = [0, 96], sizes = [8, 32], strides = [1, 1]} : vector<8x128xf32> to vector<8x32xf32>
    %313 = arith.mulf %310, %274 : vector<8x32xf32>
    %314 = arith.mulf %309, %311 : vector<8x32xf32>
    %315 = arith.addf %313, %314 : vector<8x32xf32>
    %316 = math.tanh %315 : vector<8x32xf32>
    %317 = arith.mulf %312, %316 : vector<8x32xf32>
    %318 = arith.truncf %295 : vector<8x32xf32> to vector<8x32xbf16>
    %cst_51 = arith.constant dense<0.000000e+00> : vector<8x128xf32>
    %319 = tpu.matmul %318, %2, %cst_51 {dimension_numbers = #tpu.dot_dimension_numbers<[1], [0], [0], [1], [0, 0, 1, 1], [], []>} : vector<8x32xbf16>, vector<32x128xbf16>, vector<8x128xf32> -> vector<8x128xf32>
    %320 = vector.broadcast %5 : vector<1x128xf32> to vector<8x128xf32>
    %321 = arith.addf %319, %320 : vector<8x128xf32>
    %322 = arith.truncf %317 : vector<8x32xf32> to vector<8x32xbf16>
    %cst_52 = arith.constant dense<0.000000e+00> : vector<8x128xf32>
    %323 = tpu.matmul %322, %3, %cst_52 {dimension_numbers = #tpu.dot_dimension_numbers<[1], [0], [0], [1], [0, 0, 1, 1], [], []>} : vector<8x32xbf16>, vector<32x128xbf16>, vector<8x128xf32> -> vector<8x128xf32>
    %324 = arith.addf %321, %323 : vector<8x128xf32>
    %325 = arith.negf %324 : vector<8x128xf32>
    %326 = math.exp %325 : vector<8x128xf32>
    %cst_53 = arith.constant 1.000000e+00 : f32
    %327 = vector.broadcast %cst_53 : f32 to vector<8x128xf32>
    %328 = arith.addf %327, %326 : vector<8x128xf32>
    %329 = arith.divf %327, %328 : vector<8x128xf32>
    %330 = math.tanh %324 : vector<8x128xf32>
    %331 = vector.extract_strided_slice %329 {offsets = [0, 0], sizes = [8, 32], strides = [1, 1]} : vector<8x128xf32> to vector<8x32xf32>
    %332 = vector.extract_strided_slice %329 {offsets = [0, 32], sizes = [8, 32], strides = [1, 1]} : vector<8x128xf32> to vector<8x32xf32>
    %333 = vector.extract_strided_slice %330 {offsets = [0, 64], sizes = [8, 32], strides = [1, 1]} : vector<8x128xf32> to vector<8x32xf32>
    %334 = vector.extract_strided_slice %329 {offsets = [0, 96], sizes = [8, 32], strides = [1, 1]} : vector<8x128xf32> to vector<8x32xf32>
    %335 = arith.mulf %332, %315 : vector<8x32xf32>
    %336 = arith.mulf %331, %333 : vector<8x32xf32>
    %337 = arith.addf %335, %336 : vector<8x32xf32>
    %338 = math.tanh %337 : vector<8x32xf32>
    %339 = arith.mulf %334, %338 : vector<8x32xf32>
    %340 = tpu.concatenate %71, %112, %153, %194, %235, %276, %317, %339 in 1 : vector<8x32xf32>, vector<8x32xf32>, vector<8x32xf32>, vector<8x32xf32>, vector<8x32xf32>, vector<8x32xf32>, vector<8x32xf32>, vector<8x32xf32> -> vector<8x256xf32>
    %c0_54 = arith.constant 0 : index
    %c0_55 = arith.constant 0 : index
    %341 = vector.load %arg8[%c0_54, %c0_55] : memref<8x256xf32, #tpu.memory_space<vmem>>, vector<8x256xf32>
    tpu.vector_store %arg8[%c0_54, %c0_55], %340 {strides = array<i32>} : memref<8x256xf32, #tpu.memory_space<vmem>>, vector<8x256xf32>,
    %c0_56 = arith.constant 0 : index
    %c0_57 = arith.constant 0 : index
    %c0_58 = arith.constant 0 : index
    %342 = vector.load %arg9[%c0_56, %c0_57, %c0_58] : memref<2x8x32xf32, #tpu.memory_space<vmem>>, vector<1x8x32xf32>
    %343 = vector.shape_cast %342 : vector<1x8x32xf32> to vector<8x32xf32>
    %344 = vector.shape_cast %295 : vector<8x32xf32> to vector<1x8x32xf32>
    tpu.vector_store %arg9[%c0_56, %c0_57, %c0_58], %344 {strides = array<i32>} : memref<2x8x32xf32, #tpu.memory_space<vmem>>, vector<1x8x32xf32>,
    %c1 = arith.constant 1 : index
    %c0_59 = arith.constant 0 : index
    %c0_60 = arith.constant 0 : index
    %345 = vector.load %arg9[%c1, %c0_59, %c0_60] : memref<2x8x32xf32, #tpu.memory_space<vmem>>, vector<1x8x32xf32>
    %346 = vector.shape_cast %345 : vector<1x8x32xf32> to vector<8x32xf32>
    %347 = vector.shape_cast %339 : vector<8x32xf32> to vector<1x8x32xf32>
    tpu.vector_store %arg9[%c1, %c0_59, %c0_60], %347 {strides = array<i32>} : memref<2x8x32xf32, #tpu.memory_space<vmem>>, vector<1x8x32xf32>,
    %c0_61 = arith.constant 0 : index
    %c0_62 = arith.constant 0 : index
    %c0_63 = arith.constant 0 : index
    %348 = vector.load %arg10[%c0_61, %c0_62, %c0_63] : memref<2x8x32xf32, #tpu.memory_space<vmem>>, vector<1x8x32xf32>
    %349 = vector.shape_cast %348 : vector<1x8x32xf32> to vector<8x32xf32>
    %350 = vector.shape_cast %293 : vector<8x32xf32> to vector<1x8x32xf32>
    tpu.vector_store %arg10[%c0_61, %c0_62, %c0_63], %350 {strides = array<i32>} : memref<2x8x32xf32, #tpu.memory_space<vmem>>, vector<1x8x32xf32>,
    %c1_64 = arith.constant 1 : index
    %c0_65 = arith.constant 0 : index
    %c0_66 = arith.constant 0 : index
    %351 = vector.load %arg10[%c1_64, %c0_65, %c0_66] : memref<2x8x32xf32, #tpu.memory_space<vmem>>, vector<1x8x32xf32>
    %352 = vector.shape_cast %351 : vector<1x8x32xf32> to vector<8x32xf32>
    %353 = vector.shape_cast %337 : vector<8x32xf32> to vector<1x8x32xf32>
    tpu.vector_store %arg10[%c1_64, %c0_65, %c0_66], %353 {strides = array<i32>} : memref<2x8x32xf32, #tpu.memory_space<vmem>>, vector<1x8x32xf32>,
    return
  }
  func.func @transform_0(%arg0: i32) -> (i32, i32) {
    %c0_i32 = arith.constant 0 : i32
    %c0_i32_0 = arith.constant 0 : i32
    %c0_i32_1 = arith.constant 0 : i32
    return %c0_i32, %c0_i32_0 : i32, i32
  }
  func.func @transform_1(%arg0: i32) -> (i32, i32) {
    %c0_i32 = arith.constant 0 : i32
    %c0_i32_0 = arith.constant 0 : i32
    %c0_i32_1 = arith.constant 0 : i32
    return %c0_i32, %c0_i32_0 : i32, i32
  }
  func.func @transform_2(%arg0: i32) -> (i32, i32) {
    %c0_i32 = arith.constant 0 : i32
    %c0_i32_0 = arith.constant 0 : i32
    %c0_i32_1 = arith.constant 0 : i32
    return %c0_i32, %c0_i32_0 : i32, i32
  }
  func.func @transform_3(%arg0: i32) -> (i32, i32) {
    %c0_i32 = arith.constant 0 : i32
    %c0_i32_0 = arith.constant 0 : i32
    %c0_i32_1 = arith.constant 0 : i32
    return %c0_i32, %c0_i32_0 : i32, i32
  }
  func.func @transform_4(%arg0: i32) -> (i32, i32) {
    %c0_i32 = arith.constant 0 : i32
    %c0_i32_0 = arith.constant 0 : i32
    %c0_i32_1 = arith.constant 0 : i32
    return %c0_i32, %c0_i32_0 : i32, i32
  }
  func.func @transform_5(%arg0: i32) -> (i32, i32) {
    %c0_i32 = arith.constant 0 : i32
    %c0_i32_0 = arith.constant 0 : i32
    %c0_i32_1 = arith.constant 0 : i32
    return %c0_i32, %c0_i32_0 : i32, i32
  }
  func.func @transform_6(%arg0: i32) -> (i32, i32) {
    %c0_i32 = arith.constant 0 : i32
    %c0_i32_0 = arith.constant 0 : i32
    %c0_i32_1 = arith.constant 0 : i32
    return %c0_i32, %c0_i32_0 : i32, i32
  }
  func.func @transform_7(%arg0: i32) -> (i32, i32) {
    %c0_i32 = arith.constant 0 : i32
    %c0_i32_0 = arith.constant 0 : i32
    %c0_i32_1 = arith.constant 0 : i32
    return %c0_i32, %c0_i32_0 : i32, i32
  }
  func.func @transform_8(%arg0: i32) -> (i32, i32, i32) {
    %c0_i32 = arith.constant 0 : i32
    %c0_i32_0 = arith.constant 0 : i32
    %c0_i32_1 = arith.constant 0 : i32
    %c0_i32_2 = arith.constant 0 : i32
    return %c0_i32, %c0_i32_0, %c0_i32_1 : i32, i32, i32
  }
  func.func @transform_9(%arg0: i32) -> (i32, i32, i32) {
    %c0_i32 = arith.constant 0 : i32
    %c0_i32_0 = arith.constant 0 : i32
    %c0_i32_1 = arith.constant 0 : i32
    %c0_i32_2 = arith.constant 0 : i32
    return %c0_i32, %c0_i32_0, %c0_i32_1 : i32, i32, i32
  }
}

</mosaic_0001>

<bundles_post_ra>
// kernel: tpu_custom_call.1
= control target key start
LH: loop header
LB: loop body
LE: loop exit
PB: predicated region body
PF: predicated region fallthrough
CT: control target
= control target key end

     0   :  { %15 = vsyncpa [#allocation3], 0  ;;  %s2009_s0 = inlined_call_operand.vmem [shape: f32[64,32], index: 0, kind: input, shape index: {}]   ;;  %s2010_s1 = inlined_call_operand.vmem [shape: bf16[32,128], index: 1, kind: input, shape index: {}]   ;;  %s2011_s2 = inlined_call_operand.vmem [shape: bf16[32,128], index: 2, kind: input, shape index: {}]   ;;  %s2012_s3 = inlined_call_operand.vmem [shape: f32[1,128], index: 3, kind: input, shape index: {}]   ;;  %s2013_s4 = inlined_call_operand.vmem [shape: bf16[32,128], index: 4, kind: input, shape index: {}]   ;;  %s2014_s5 = inlined_call_operand.vmem [shape: bf16[32,128], index: 5, kind: input, shape index: {}]   ;;  %s2015_s6 = inlined_call_operand.vmem [shape: f32[1,128], index: 6, kind: input, shape index: {}]   ;;  %s2016_s7 = inlined_call_operand.hbm [shape: f32[8,256], index: 7, kind: output, shape index: {0}]   ;;  %s2017_s8 = inlined_call_operand.hbm [shape: f32[2,8,32], index: 8, kind: output, shape index: {1}]   ;;  %s2018_s9 = inlined_call_operand.hbm [shape: f32[2,8,32], index: 9, kind: output, shape index: {2}]  }
   0x1   :  { %v1368_v0 = vld [vmem:[%s2010_s1 + $0x8] sm:$0xff]  ;;  %v1367_v2 = vld [vmem:[%s2010_s1] sm:$0xff] }
   0x2   :  { %v1657_v1 = vld [vmem:[%s2011_s2 + $0x8] sm:$0xff]  ;;  %v1665_v3 = vld [vmem:[%s2011_s2] sm:$0xff]  ;;  %96 = vmatpush.bf16.msra.mxu0 %v1368_v0 }
   0x3   :  { %v50_v4 = vld [vmem:[%s2009_s0] sm:$0xff]  ;;  %140 = vmatpush.bf16.msra.mxu1 %v1657_v1  ;;  %v51_v5 = vld [vmem:[%s2009_s0 + $0x8] sm:$0xff]  ;;  %198 = vmatpush.bf16.msra.mxu2 %v1657_v1 }
   0x4   :  { %16 = vsyncpa [#allocation5], 0  ;;  %v58_v6 = vpack.c.bf16 %v51_v5, %v50_v4  ;;  %vm77_vm0 = vcmask 261120   ;;  %v1592_v7 = vmov 0   ;;  %v1683_v8 = vld [vmem:[%s2012_s3] ss:$0 sm:$0xff] }
   0x5   :  { %s1593_s21 = smov 64   ;;  %s1594_s22 = smov 32   ;;  %v1695_v34 = vld [vmem:[%s2013_s4 + $0x8] sm:$0xff]  ;;  %v1701_v35 = vld [vmem:[%s2013_s4] sm:$0xff] }
   0x6   :  { %97 = vmatpush.bf16.msra.mxu0 %v1367_v2  ;;  %264 = vmatpush.bf16.msra.mxu3 %v1695_v34  ;;  %v1710_v39 = vld [vmem:[%s2014_s5 + $0x8] sm:$0xff]  ;;  %v1716_v40 = vld [vmem:[%s2014_s5] sm:$0xff]  ;;  %s1249_s27 = sshll.u32 %s2016_s7, 4  ;;  %s1259_s29 = sshll.u32 %s2017_s8, 4  ;;  %s1250_s27 = int_to_ptr.hbm [resolvable:$true] %s1249_s27  ;;  %s1260_s29 = int_to_ptr.hbm [resolvable:$true] %s1259_s29 }
   0x7   :  { %141 = vmatpush.bf16.msra.mxu1 %v1665_v3  ;;  %199 = vmatpush.bf16.msra.mxu2 %v1665_v3  ;;  %v1737_v46 = vld [vmem:[%s2015_s6] ss:$0 sm:$0xff]  ;;  %s1598_s5 = smov [#allocation6]   ;;  %s1272_s12 = sshll.u32 %s2018_s9, 4  ;;  %s1273_s12 = int_to_ptr.hbm [resolvable:$true] %s1272_s12 }
   0x8   :  { %s1270_s30 = sshll.u32 %s1598_s5, 4  ;;  %s1599_s13 = smov 128   ;;  %s1271_s30 = int_to_ptr.vmem [resolvable:$true] %s1270_s30 }
   0x9   :  { %1301 = vmatmul.msk.bf16.vlgmr.msra.gmra.mxu0 %vm77_vm0, %v58_v6  ;;  %s1600_s14 = smov 8  }
   0xa   :  { %142 = vmatmul.bf16.vlgmr.msra.gmra.mxu1 %v1592_v7  ;;  %265 = vmatpush.bf16.msra.mxu3 %v1701_v35 }
   0xb   :  { %347 = vmatpush.bf16.msrb.mxu2 %v1657_v1  ;;  %289 = vmatpush.bf16.msrb.mxu1 %v1710_v39 }
   0xc   :  { %676 = vmatpush.bf16.msrb.mxu0 %v1710_v39 }
   0xe   :  { %398 = vmatpush.bf16.msrb.mxu3 %v1695_v34 }
   0xf   :  { %348 = vmatpush.bf16.msrb.mxu2 %v1665_v3  ;;  %290 = vmatpush.bf16.msrb.mxu1 %v1716_v40 }
  0x10   :  { %677 = vmatpush.bf16.msrb.mxu0 %v1716_v40 }
  0x12   :  { %399 = vmatpush.bf16.msrb.mxu3 %v1701_v35 }
  0x13   :  { %418 = vmatpush.bf16.msra.mxu1 %v1710_v39 }
  0x14   :  { %863 = vmatpush.bf16.msra.mxu0 %v1657_v1 }
  0x17   :  { %419 = vmatpush.bf16.msra.mxu1 %v1716_v40 }
  0x18   :  { %864 = vmatpush.bf16.msra.mxu0 %v1665_v3 }
  0x1a   :  { %291 = vmatmul.bf16.vlgmr.msrb.gmra.mxu1 %v1592_v7 }
  0x1b   :  { %547 = vmatpush.bf16.msrb.mxu1 %v1710_v39 }
  0x1f   :  { %548 = vmatpush.bf16.msrb.mxu1 %v1716_v40 }
  0x86   :  { %v99_v9 = vpop.f32.mrf.mxu0 }
  0x87   :  { %v143_v10 = vpop.f32.mrf.mxu1  ;;  %v100_v11 = vadd.f32 %v1683_v8, %v99_v9 }
  0x89   :  { %v147_v12 = vadd.f32 %v143_v10, %v100_v11 }
  0x8b   :  { %1386 = vtanh.f32 %v147_v12  ;;  %v1313_v15 = vmul.f32 -1.442695, %v147_v12 }
  0x8d   :  { %1388 = vpow2.f32 %v1313_v15 }
  0x8e   :  { %v101_v44 = vpop.f32.mrf.mxu0 }
  0x8f   :  { %v145_v13 = vpop.f32.mrf.mxu1  ;;  %v102_v45 = vadd.f32 %v1683_v8, %v101_v44 }
  0x91   :  { %v1387_v14 = vpop.eup %1386 }
  0x92   :  { %170 = vrot.lane.b32.xlu0 %v1387_v14, %s1593_s21 }
  0x93   :  { %v1389_v16 = vpop.eup %1388 }
  0x94   :  { %v151_v17 = vadd.f32 1.0, %v1389_v16 }
  0x96   :  { %1390 = vrcp.f32 %v151_v17  ;;  %v163_v23 = vand.u32 2147483648, %v151_v17  ;;  %vm157_vm2 = vweird.f32 %v151_v17  ;;  %v161_v24 = vand.u32 2147483647, %v151_v17 }
  0x97   :  { %v292_v42 = vpop.f32.mrf.mxu1 }
  0x98   :  { %v164_v26 = vor.u32 1.1754944e-38, %v163_v23  ;;  %vm162_vm4 = vcmp.eq.f32.partialorder %v161_v24, 8.507059e+37 }
  0x9c   :  { %v1391_v18 = vpop.eup %1390 }
  0x9d   :  { %v153_v19 = vmul.f32 %v1391_v18, %v151_v17  ;;  %vm158_vm1 = vweird.f32 %v1391_v18 }
  0x9e   :  { %vm159_vm3 = vmor %vm157_vm2, %vm158_vm1 }
  0x9f   :  { %v154_v20 = vsub.f32 1.0, %v153_v19  ;;  %v294_v43 = vpop.f32.mrf.mxu1 }
  0xa1   :  { %v155_v21 = vmul.f32 %v1391_v18, %v154_v20 }
  0xa3   :  { %v156_v22 = vadd.f32 %v1391_v18, %v155_v21 }
  0xa5   :  { %v160_v25 = vsel %vm159_vm3, %v1391_v18, %v156_v22 }
  0xa6   :  { %v165_v28 = vsel %vm162_vm4, %v164_v26, %v160_v25 }
  0xa7   :  { %v168_v30 = vmul.f32 0.0, %v165_v28 }
 0x104   :  { %v171_v27 = vpop.permute.xlu0 %170 }
 0x105   :  { %v173_v29 = vmul.f32 %v171_v27, %v165_v28 }
 0x107   :  { %175 = vrot.lane.b32.xlu0 %v173_v29, %s1594_s22 }
 0x179   :  { %v176_v31 = vpop.permute.xlu0 %175 }
 0x17a   :  { %v1688_v32 = vadd.f32 %v176_v31, %v168_v30 }
 0x17c   :  { %1392 = vtanh.f32 %v1688_v32 }
 0x182   :  { %v1393_v33 = vpop.eup %1392 }
 0x183   :  { %181 = vrot.lane.b32.xlu1 %v1393_v33, %s1593_s21 }
 0x1f5   :  { %v182_v36 = vpop.permute.xlu1 %181 }
 0x1f6   :  { %v184_v37 = vmul.f32 %v182_v36, %v165_v28 }
 0x1f8   :  { %v185_v38 = vpack.c.bf16 %v184_v37, %v184_v37 }
 0x1fa   :  { %187 = vrot.lane.b32.xlu1 %v185_v38, %s1594_s22  ;;  %v52_v38 = vld [vmem:[%s2009_s0 + $0x10] sm:$0xff] }
 0x26c   :  { %v188_v41 = vpop.permute.xlu1 %187 }
 0x26d   :  { %1314 = vmatmul.msk.bf16.vlgmr.msra.gmra.mxu2 %vm77_vm0, %v188_v41  ;;  %1324 = vmatmul.msk.bf16.vlgmr.msra.gmra.mxu3 %vm77_vm0, %v188_v41  ;;  %v53_v41 = vld [vmem:[%s2009_s0 + $0x18] sm:$0xff] }
 0x26e   :  { %476 = vmatpush.bf16.msra.mxu2 %v1657_v1  ;;  %527 = vmatpush.bf16.msra.mxu3 %v1695_v34 }
 0x272   :  { %477 = vmatpush.bf16.msra.mxu2 %v1665_v3  ;;  %528 = vmatpush.bf16.msra.mxu3 %v1701_v35 }
 0x2f0   :  { %v201_v47 = vpop.f32.mrf.mxu2  ;;  %v267_v48 = vpop.f32.mrf.mxu3 }
 0x2f1   :  { %v205_v49 = vadd.f32 %v201_v47, %v102_v45  ;;  %v268_v50 = vadd.f32 %v1737_v46, %v267_v48 }
 0x2f3   :  { %1394 = vtanh.f32 %v205_v49  ;;  %v296_v51 = vadd.f32 %v292_v42, %v268_v50  ;;  %v1315_v56 = vmul.f32 -1.442695, %v205_v49  ;;  %v59_v42 = vpack.c.bf16 %v53_v41, %v52_v38 }
 0x2f5   :  { %1396 = vtanh.f32 %v296_v51  ;;  %v1333_v57 = vmul.f32 -1.442695, %v296_v51  ;;  %1302 = vmatmul.msk.bf16.gmra.mxu0 %vm77_vm0, %v59_v42 }
 0x2f6   :  { %1398 = vpow2.f32 %v1315_v56 }
 0x2f7   :  { %1400 = vpow2.f32 %v1333_v57 }
 0x2f8   :  { %v203_v52 = vpop.f32.mrf.mxu2  ;;  %v269_v53 = vpop.f32.mrf.mxu3 }
 0x2f9   :  { %v1395_v54 = vpop.eup %1394 }
 0x2fa   :  { %228 = vrot.lane.b32.xlu2 %v1395_v54, %s1593_s21 }
 0x2fb   :  { %v1397_v55 = vpop.eup %1396 }
 0x2fc   :  { %v1399_v58 = vpop.eup %1398 }
 0x2fd   :  { %v209_v59 = vadd.f32 1.0, %v1399_v58  ;;  %v1401_v60 = vpop.eup %1400 }
 0x2fe   :  { %v300_v61 = vadd.f32 1.0, %v1401_v60 }
 0x2ff   :  { %1402 = vrcp.f32 %v209_v59  ;;  %v221_v9 = vand.u32 2147483648, %v209_v59  ;;  %vm215_vm6 = vweird.f32 %v209_v59  ;;  %v219_v10 = vand.u32 2147483647, %v209_v59 }
 0x300   :  { %1404 = vrcp.f32 %v300_v61  ;;  %v312_v18 = vand.u32 2147483648, %v300_v61  ;;  %vm306_vm10 = vweird.f32 %v300_v61  ;;  %v310_v19 = vand.u32 2147483647, %v300_v61 }
 0x301   :  { %v222_v13 = vor.u32 1.1754944e-38, %v221_v9  ;;  %vm220_vm8 = vcmp.eq.f32.partialorder %v219_v10, 8.507059e+37 }
 0x302   :  { %319 = vrot.lane.b32.xlu2 %v1397_v55, %s1593_s21  ;;  %v313_v21 = vor.u32 1.1754944e-38, %v312_v18  ;;  %vm311_vm12 = vcmp.eq.f32.partialorder %v310_v19, 8.507059e+37 }
 0x305   :  { %v1403_v62 = vpop.eup %1402 }
 0x306   :  { %v211_v63 = vmul.f32 %v1403_v62, %v209_v59  ;;  %v1405_v2 = vpop.eup %1404  ;;  %vm216_vm5 = vweird.f32 %v1403_v62 }
 0x307   :  { %v302_v5 = vmul.f32 %v1405_v2, %v300_v61  ;;  %vm217_vm7 = vmor %vm215_vm6, %vm216_vm5  ;;  %vm307_vm9 = vweird.f32 %v1405_v2 }
 0x308   :  { %v212_v0 = vsub.f32 1.0, %v211_v63  ;;  %vm308_vm11 = vmor %vm306_vm10, %vm307_vm9 }
 0x309   :  { %v303_v7 = vsub.f32 1.0, %v302_v5 }
 0x30a   :  { %v213_v4 = vmul.f32 %v1403_v62, %v212_v0 }
 0x30b   :  { %v304_v12 = vmul.f32 %v1405_v2, %v303_v7 }
 0x30c   :  { %v214_v6 = vadd.f32 %v1403_v62, %v213_v4 }
 0x30d   :  { %v305_v17 = vadd.f32 %v1405_v2, %v304_v12 }
 0x30e   :  { %v218_v11 = vsel %vm217_vm7, %v1403_v62, %v214_v6 }
 0x30f   :  { %v223_v15 = vsel %vm220_vm8, %v222_v13, %v218_v11  ;;  %v309_v20 = vsel %vm308_vm11, %v1405_v2, %v305_v17 }
 0x310   :  { %v314_v22 = vsel %vm311_vm12, %v313_v21, %v309_v20  ;;  %v226_v25 = vmul.f32 %v223_v15, %v1688_v32 }
 0x311   :  { %v317_v28 = vmul.f32 0.0, %v314_v22 }
 0x354   :  { %v229_v14 = vpop.permute.xlu2 %228 }
 0x355   :  { %v231_v16 = vmul.f32 %v229_v14, %v223_v15 }
 0x357   :  { %233 = vrot.lane.b32.xlu0 %v231_v16, %s1594_s22 }
 0x35c   :  { %v320_v23 = vpop.permute.xlu2 %319 }
 0x35d   :  { %v322_v24 = vmul.f32 %v320_v23, %v314_v22 }
 0x35f   :  { %324 = vrot.lane.b32.xlu1 %v322_v24, %s1594_s22 }
 0x372   :  { %v104_v49 = vpop.f32.mrf.mxu0 }
 0x373   :  { %v105_v50 = vadd.f32 %v1683_v8, %v104_v49 }
 0x3c9   :  { %v234_v26 = vpop.permute.xlu0 %233 }
 0x3ca   :  { %v1745_v27 = vadd.f32 %v234_v26, %v226_v25 }
 0x3cc   :  { %1406 = vtanh.f32 %v1745_v27 }
 0x3d1   :  { %v325_v29 = vpop.permute.xlu1 %324 }
 0x3d2   :  { %v1407_v30 = vpop.eup %1406  ;;  %v1748_v31 = vadd.f32 %v325_v29, %v317_v28 }
 0x3d3   :  { %239 = vrot.lane.b32.xlu2 %v1407_v30, %s1593_s21 }
 0x3d4   :  { %1408 = vtanh.f32 %v1748_v31 }
 0x3da   :  { %v1409_v33 = vpop.eup %1408 }
 0x3db   :  { %330 = vrot.lane.b32.xlu0 %v1409_v33, %s1593_s21 }
 0x42d   :  { %v240_v36 = vpop.permute.xlu2 %239 }
 0x42e   :  { %v242_v37 = vmul.f32 %v240_v36, %v223_v15 }
 0x430   :  { %v334_v32 = vpack.c.bf16 %v242_v37, %v242_v37 }
 0x432   :  { %336 = vrot.lane.b32.xlu1 %v334_v32, %s1594_s22 }
 0x44d   :  { %v331_v43 = vpop.permute.xlu0 %330 }
 0x44e   :  { %v1761_v44 = vmul.f32 %v331_v43, %v314_v22 }
 0x450   :  { %v405_v45 = vpack.c.bf16 %v1761_v44, %v1761_v44 }
 0x452   :  { %407 = vrot.lane.b32.xlu2 %v405_v45, %s1594_s22 }
 0x4a4   :  { %v337_v47 = vpop.permute.xlu1 %336 }
 0x4a5   :  { %1334 = vmatmul.msk.bf16.vlgmr.msrb.gmra.mxu2 %vm77_vm0, %v337_v47  ;;  %1336 = vmatmul.msk.bf16.vlgmr.msrb.gmra.mxu3 %vm77_vm0, %v337_v47 }
 0x4a6   :  { %605 = vmatpush.bf16.msrb.mxu2 %v1657_v1  ;;  %656 = vmatpush.bf16.msrb.mxu3 %v1695_v34 }
 0x4aa   :  { %606 = vmatpush.bf16.msrb.mxu2 %v1665_v3  ;;  %657 = vmatpush.bf16.msrb.mxu3 %v1701_v35 }
 0x4ac   :  { %v408_v48 = vpop.permute.xlu2 %407 }
 0x4ad   :  { %1337 = vmatmul.msk.bf16.vlgmr.msra.gmra.mxu1 %vm77_vm0, %v408_v48 }
 0x4ae   :  { %734 = vmatpush.bf16.msra.mxu1 %v1657_v1 }
 0x4b2   :  { %735 = vmatpush.bf16.msra.mxu1 %v1665_v3 }
 0x528   :  { %v350_v51 = vpop.f32.mrf.mxu2  ;;  %v401_v52 = vpop.f32.mrf.mxu3 }
 0x529   :  { %v354_v53 = vadd.f32 %v350_v51, %v105_v50  ;;  %v402_v54 = vadd.f32 %v1737_v46, %v401_v52 }
 0x52a   :  { %v421_v55 = vpop.f32.mrf.mxu1 }
 0x52b   :  { %1410 = vtanh.f32 %v354_v53  ;;  %v425_v56 = vadd.f32 %v421_v55, %v402_v54  ;;  %v1335_v62 = vmul.f32 -1.442695, %v354_v53  ;;  %v106_v53 = vpop.f32.mrf.mxu0 }
 0x52c   :  { %v107_v55 = vadd.f32 %v1683_v8, %v106_v53 }
 0x52d   :  { %1412 = vtanh.f32 %v425_v56  ;;  %v1338_v63 = vmul.f32 -1.442695, %v425_v56 }
 0x52e   :  { %1414 = vpow2.f32 %v1335_v62 }
 0x52f   :  { %1416 = vpow2.f32 %v1338_v63 }
 0x530   :  { %v352_v57 = vpop.f32.mrf.mxu2  ;;  %v403_v58 = vpop.f32.mrf.mxu3 }
 0x531   :  { %v1411_v59 = vpop.eup %1410 }
 0x532   :  { %v423_v60 = vpop.f32.mrf.mxu1  ;;  %377 = vrot.lane.b32.xlu0 %v1411_v59, %s1593_s21 }
 0x533   :  { %v1413_v61 = vpop.eup %1412 }
 0x534   :  { %448 = vrot.lane.b32.xlu1 %v1413_v61, %s1593_s21  ;;  %v1415_v0 = vpop.eup %1414 }
 0x535   :  { %v1417_v2 = vpop.eup %1416  ;;  %v358_v4 = vadd.f32 1.0, %v1415_v0 }
 0x536   :  { %v429_v5 = vadd.f32 1.0, %v1417_v2 }
 0x537   :  { %1418 = vrcp.f32 %v358_v4  ;;  %v370_v16 = vand.u32 2147483648, %v358_v4  ;;  %vm364_vm14 = vweird.f32 %v358_v4  ;;  %v368_v17 = vand.u32 2147483647, %v358_v4 }
 0x538   :  { %1420 = vrcp.f32 %v429_v5  ;;  %v441_v20 = vand.u32 2147483648, %v429_v5  ;;  %vm435_vm2 = vweird.f32 %v429_v5  ;;  %v439_v22 = vand.u32 2147483647, %v429_v5 }
 0x539   :  { %v371_v21 = vor.u32 1.1754944e-38, %v370_v16  ;;  %vm369_vm3 = vcmp.eq.f32.partialorder %v368_v17, 8.507059e+37 }
 0x53a   :  { %v442_v28 = vor.u32 1.1754944e-38, %v441_v20  ;;  %vm440_vm5 = vcmp.eq.f32.partialorder %v439_v22, 8.507059e+37 }
 0x53d   :  { %v1419_v6 = vpop.eup %1418 }
 0x53e   :  { %v1421_v7 = vpop.eup %1420  ;;  %v360_v9 = vmul.f32 %v1419_v6, %v358_v4  ;;  %vm365_vm13 = vweird.f32 %v1419_v6 }
 0x53f   :  { %v431_v10 = vmul.f32 %v1421_v7, %v429_v5  ;;  %vm366_vm15 = vmor %vm364_vm14, %vm365_vm13  ;;  %vm436_vm1 = vweird.f32 %v1421_v7 }
 0x540   :  { %v361_v11 = vsub.f32 1.0, %v360_v9  ;;  %vm437_vm4 = vmor %vm435_vm2, %vm436_vm1 }
 0x541   :  { %v432_v12 = vsub.f32 1.0, %v431_v10 }
 0x542   :  { %v362_v13 = vmul.f32 %v1419_v6, %v361_v11 }
 0x543   :  { %v433_v14 = vmul.f32 %v1421_v7, %v432_v12 }
 0x544   :  { %v363_v15 = vadd.f32 %v1419_v6, %v362_v13 }
 0x545   :  { %v434_v18 = vadd.f32 %v1421_v7, %v433_v14 }
 0x546   :  { %v367_v19 = vsel %vm366_vm15, %v1419_v6, %v363_v15 }
 0x547   :  { %v372_v24 = vsel %vm369_vm3, %v371_v21, %v367_v19  ;;  %v438_v25 = vsel %vm437_vm4, %v1421_v7, %v434_v18 }
 0x548   :  { %v443_v30 = vsel %vm440_vm5, %v442_v28, %v438_v25  ;;  %v375_v36 = vmul.f32 %v372_v24, %v1745_v27 }
 0x549   :  { %v446_v41 = vmul.f32 %v443_v30, %v1748_v31 }
 0x5a4   :  { %v378_v23 = vpop.permute.xlu0 %377 }
 0x5a5   :  { %v380_v26 = vmul.f32 %v378_v23, %v372_v24 }
 0x5a6   :  { %v449_v29 = vpop.permute.xlu1 %448 }
 0x5a7   :  { %382 = vrot.lane.b32.xlu2 %v380_v26, %s1594_s22  ;;  %v451_v33 = vmul.f32 %v449_v29, %v443_v30 }
 0x5a9   :  { %453 = vrot.lane.b32.xlu0 %v451_v33, %s1594_s22 }
 0x601   :  { %v383_v37 = vpop.permute.xlu2 %382 }
 0x602   :  { %v1782_v32 = vadd.f32 %v383_v37, %v375_v36 }
 0x604   :  { %1422 = vtanh.f32 %v1782_v32 }
 0x60a   :  { %v1423_v38 = vpop.eup %1422 }
 0x60b   :  { %388 = vrot.lane.b32.xlu1 %v1423_v38, %s1593_s21 }
 0x61b   :  { %v454_v42 = vpop.permute.xlu0 %453 }
 0x61c   :  { %v1787_v43 = vadd.f32 %v454_v42, %v446_v41 }
 0x61e   :  { %1424 = vtanh.f32 %v1787_v43 }
 0x624   :  { %v1425_v45 = vpop.eup %1424 }
 0x625   :  { %459 = vrot.lane.b32.xlu2 %v1425_v45, %s1593_s21 }
 0x67d   :  { %v389_v47 = vpop.permute.xlu1 %388 }
 0x67e   :  { %v391_v27 = vmul.f32 %v389_v47, %v372_v24 }
 0x67f   :  { %v460_v49 = vpop.permute.xlu2 %459 }
 0x680   :  { %v463_v48 = vpack.c.bf16 %v391_v27, %v391_v27  ;;  %v1791_v50 = vmul.f32 %v460_v49, %v443_v30 }
 0x682   :  { %465 = vrot.lane.b32.xlu0 %v463_v48, %s1594_s22  ;;  %v534_v51 = vpack.c.bf16 %v1791_v50, %v1791_v50 }
 0x684   :  { %536 = vrot.lane.b32.xlu1 %v534_v51, %s1594_s22 }
 0x6f4   :  { %v466_v31 = vpop.permute.xlu0 %465 }
 0x6f5   :  { %1339 = vmatmul.msk.bf16.vlgmr.msra.gmra.mxu2 %vm77_vm0, %v466_v31  ;;  %1341 = vmatmul.msk.bf16.vlgmr.msra.gmra.mxu3 %vm77_vm0, %v466_v31 }
 0x6f6   :  { %785 = vmatpush.bf16.msra.mxu2 %v1695_v34  ;;  %805 = vmatpush.bf16.msra.mxu3 %v1710_v39  ;;  %v537_v52 = vpop.permute.xlu1 %536 }
 0x6f7   :  { %1342 = vmatmul.msk.bf16.vlgmr.msrb.gmra.mxu1 %vm77_vm0, %v537_v52 }
 0x6f8   :  { %914 = vmatpush.bf16.msrb.mxu1 %v1695_v34 }
 0x6fa   :  { %786 = vmatpush.bf16.msra.mxu2 %v1701_v35  ;;  %806 = vmatpush.bf16.msra.mxu3 %v1716_v40 }
 0x6fc   :  { %915 = vmatpush.bf16.msrb.mxu1 %v1701_v35 }
 0x774   :  { %v550_v54 = vpop.f32.mrf.mxu1 }
 0x778   :  { %v479_v56 = vpop.f32.mrf.mxu2  ;;  %v530_v57 = vpop.f32.mrf.mxu3 }
 0x779   :  { %v483_v58 = vadd.f32 %v479_v56, %v107_v55  ;;  %v531_v59 = vadd.f32 %v1737_v46, %v530_v57 }
 0x77b   :  { %1426 = vtanh.f32 %v483_v58  ;;  %v554_v60 = vadd.f32 %v550_v54, %v531_v59  ;;  %v1340_v4 = vmul.f32 -1.442695, %v483_v58  ;;  %v56_v59 = vld [vmem:[%s2009_s0 + $0x30] sm:$0xff] }
 0x77c   :  { %v552_v61 = vpop.f32.mrf.mxu1 }
 0x77d   :  { %1428 = vtanh.f32 %v554_v60  ;;  %v1343_v10 = vmul.f32 -1.442695, %v554_v60  ;;  %v57_v60 = vld [vmem:[%s2009_s0 + $0x38] sm:$0xff] }
 0x77e   :  { %1430 = vpow2.f32 %v1340_v4  ;;  %v61_v61 = vpack.c.bf16 %v57_v60, %v56_v59 }
 0x780   :  { %v481_v62 = vpop.f32.mrf.mxu2  ;;  %v532_v63 = vpop.f32.mrf.mxu3 }
 0x781   :  { %v1427_v0 = vpop.eup %1426 }
 0x782   :  { %506 = vrot.lane.b32.xlu2 %v1427_v0, %s1593_s21 }
 0x783   :  { %v1429_v2 = vpop.eup %1428 }
 0x784   :  { %577 = vrot.lane.b32.xlu0 %v1429_v2, %s1593_s21  ;;  %v1431_v5 = vpop.eup %1430 }
 0x785   :  { %v487_v6 = vadd.f32 1.0, %v1431_v5 }
 0x787   :  { %1432 = vrcp.f32 %v487_v6  ;;  %v499_v15 = vand.u32 2147483648, %v487_v6  ;;  %vm493_vm7 = vweird.f32 %v487_v6  ;;  %v497_v17 = vand.u32 2147483647, %v487_v6 }
 0x788   :  { %1434 = vpow2.f32 %v1343_v10 }
 0x789   :  { %v500_v19 = vor.u32 1.1754944e-38, %v499_v15  ;;  %vm498_vm9 = vcmp.eq.f32.partialorder %v497_v17, 8.507059e+37 }
 0x78d   :  { %v1433_v7 = vpop.eup %1432 }
 0x78e   :  { %v489_v9 = vmul.f32 %v1433_v7, %v487_v6  ;;  %v1435_v13 = vpop.eup %1434  ;;  %vm494_vm6 = vweird.f32 %v1433_v7 }
 0x78f   :  { %v558_v16 = vadd.f32 1.0, %v1435_v13  ;;  %vm495_vm8 = vmor %vm493_vm7, %vm494_vm6 }
 0x790   :  { %v490_v11 = vsub.f32 1.0, %v489_v9 }
 0x791   :  { %1436 = vrcp.f32 %v558_v16  ;;  %v570_v29 = vand.u32 2147483648, %v558_v16  ;;  %vm564_vm11 = vweird.f32 %v558_v16  ;;  %v568_v30 = vand.u32 2147483647, %v558_v16 }
 0x792   :  { %v491_v12 = vmul.f32 %v1433_v7, %v490_v11 }
 0x793   :  { %v571_v36 = vor.u32 1.1754944e-38, %v570_v29  ;;  %vm569_vm13 = vcmp.eq.f32.partialorder %v568_v30, 8.507059e+37 }
 0x794   :  { %v492_v14 = vadd.f32 %v1433_v7, %v491_v12 }
 0x796   :  { %v496_v18 = vsel %vm495_vm8, %v1433_v7, %v492_v14 }
 0x797   :  { %v501_v21 = vsel %vm498_vm9, %v500_v19, %v496_v18  ;;  %v1437_v23 = vpop.eup %1436 }
 0x798   :  { %v560_v24 = vmul.f32 %v1437_v23, %v558_v16  ;;  %vm565_vm10 = vweird.f32 %v1437_v23  ;;  %v504_v42 = vmul.f32 %v501_v21, %v1782_v32  ;;  %v54_v32 = vld [vmem:[%s2009_s0 + $0x20] sm:$0xff] }
 0x799   :  { %vm566_vm12 = vmor %vm564_vm11, %vm565_vm10 }
 0x79a   :  { %v561_v25 = vsub.f32 1.0, %v560_v24 }
 0x79c   :  { %v562_v26 = vmul.f32 %v1437_v23, %v561_v25 }
 0x79e   :  { %v563_v28 = vadd.f32 %v1437_v23, %v562_v26 }
 0x7a0   :  { %v567_v33 = vsel %vm566_vm12, %v1437_v23, %v563_v28 }
 0x7a1   :  { %v572_v38 = vsel %vm569_vm13, %v571_v36, %v567_v33 }
 0x7a2   :  { %v575_v27 = vmul.f32 %v572_v38, %v1787_v43  ;;  %v55_v43 = vld [vmem:[%s2009_s0 + $0x28] sm:$0xff] }
 0x7a3   :  { %v60_v52 = vpack.c.bf16 %v55_v43, %v54_v32 }
 0x7a5   :  { %1303 = vmatmul.msk.bf16.gmra.mxu0 %vm77_vm0, %v60_v52 }
 0x7b5   :  { %1304 = vmatmul.msk.bf16.gmra.mxu0 %vm77_vm0, %v61_v61 }
 0x7dc   :  { %v507_v20 = vpop.permute.xlu2 %506 }
 0x7dd   :  { %v509_v22 = vmul.f32 %v507_v20, %v501_v21 }
 0x7df   :  { %511 = vrot.lane.b32.xlu1 %v509_v22, %s1594_s22 }
 0x7f6   :  { %v578_v37 = vpop.permute.xlu0 %577 }
 0x7f7   :  { %v580_v41 = vmul.f32 %v578_v37, %v572_v38 }
 0x7f9   :  { %582 = vrot.lane.b32.xlu2 %v580_v41, %s1594_s22 }
 0x822   :  { %v109_v0 = vpop.f32.mrf.mxu0 }
 0x823   :  { %v110_v4 = vadd.f32 %v1683_v8, %v109_v0 }
 0x82a   :  { %v1851_v2 = vpop.f32.mrf.mxu0 }
 0x851   :  { %v512_v45 = vpop.permute.xlu1 %511 }
 0x852   :  { %v1813_v47 = vadd.f32 %v512_v45, %v504_v42 }
 0x853   :  { %v583_v48 = vpop.permute.xlu2 %582 }
 0x854   :  { %1438 = vtanh.f32 %v1813_v47  ;;  %v1817_v49 = vadd.f32 %v583_v48, %v575_v27 }
 0x856   :  { %1440 = vtanh.f32 %v1817_v49 }
 0x85a   :  { %v1439_v51 = vpop.eup %1438 }
 0x85b   :  { %517 = vrot.lane.b32.xlu0 %v1439_v51, %s1593_s21 }
 0x85c   :  { %v1441_v31 = vpop.eup %1440 }
 0x85d   :  { %588 = vrot.lane.b32.xlu1 %v1441_v31, %s1593_s21 }
 0x8cd   :  { %v518_v53 = vpop.permute.xlu0 %517 }
 0x8ce   :  { %v520_v54 = vmul.f32 %v518_v53, %v501_v21 }
 0x8cf   :  { %v589_v56 = vpop.permute.xlu1 %588 }
 0x8d0   :  { %v592_v55 = vpack.c.bf16 %v520_v54, %v520_v54  ;;  %v1829_v57 = vmul.f32 %v589_v56, %v572_v38 }
 0x8d2   :  { %594 = vrot.lane.b32.xlu2 %v592_v55, %s1594_s22  ;;  %v663_v58 = vpack.c.bf16 %v1829_v57, %v1829_v57 }
 0x8d4   :  { %665 = vrot.lane.b32.xlu0 %v663_v58, %s1594_s22 }
 0x92c   :  { %v595_v62 = vpop.permute.xlu2 %594 }
 0x92d   :  { %1344 = vmatmul.msk.bf16.vlgmr.msrb.gmra.mxu2 %vm77_vm0, %v595_v62  ;;  %1346 = vmatmul.msk.bf16.vlgmr.msrb.gmra.mxu3 %vm77_vm0, %v595_v62 }
 0x92e   :  { %934 = vmatpush.bf16.msrb.mxu2 %v1710_v39  ;;  %992 = vmatpush.bf16.msrb.mxu3 %v1657_v1  ;;  %v1854_v1 = vpop.f32.mrf.mxu0 }
 0x932   :  { %935 = vmatpush.bf16.msrb.mxu2 %v1716_v40  ;;  %993 = vmatpush.bf16.msrb.mxu3 %v1665_v3 }
 0x936   :  { %v1857_v11 = vpop.f32.mrf.mxu0 }
 0x946   :  { %v666_v63 = vpop.permute.xlu0 %665 }
 0x947   :  { %1347 = vmatmul.msk.bf16.vlgmr.msrb.gmra.mxu0 %vm77_vm0, %v666_v63 }
 0x948   :  { %1043 = vmatpush.bf16.msrb.mxu0 %v1695_v34 }
 0x94c   :  { %1044 = vmatpush.bf16.msrb.mxu0 %v1701_v35 }
 0x9b0   :  { %v608_v5 = vpop.f32.mrf.mxu2  ;;  %v659_v6 = vpop.f32.mrf.mxu3 }
 0x9b1   :  { %v612_v7 = vadd.f32 %v608_v5, %v110_v4  ;;  %v660_v12 = vadd.f32 %v1737_v46, %v659_v6 }
 0x9b3   :  { %1442 = vtanh.f32 %v612_v7  ;;  %v1345_v18 = vmul.f32 -1.442695, %v612_v7 }
 0x9b8   :  { %v610_v9 = vpop.f32.mrf.mxu2  ;;  %v661_v3 = vpop.f32.mrf.mxu3 }
 0x9b9   :  { %v1443_v10 = vpop.eup %1442 }
 0x9ba   :  { %635 = vrot.lane.b32.xlu1 %v1443_v10, %s1593_s21  ;;  %v112_v10 = vadd.f32 %v1683_v8, %v1851_v2 }
 0x9c4   :  { %v679_v13 = vpop.f32.mrf.mxu0 }
 0x9c5   :  { %v683_v14 = vadd.f32 %v679_v13, %v660_v12 }
 0x9c7   :  { %1444 = vtanh.f32 %v683_v14  ;;  %v1348_v17 = vmul.f32 -1.442695, %v683_v14 }
 0x9c9   :  { %1446 = vpow2.f32 %v1348_v17 }
 0x9ca   :  { %1448 = vpow2.f32 %v1345_v18 }
 0x9cc   :  { %v681_v15 = vpop.f32.mrf.mxu0 }
 0x9cd   :  { %v1445_v16 = vpop.eup %1444 }
 0x9ce   :  { %706 = vrot.lane.b32.xlu2 %v1445_v16, %s1593_s21 }
 0x9cf   :  { %v1447_v19 = vpop.eup %1446 }
 0x9d0   :  { %v1449_v20 = vpop.eup %1448  ;;  %v687_v21 = vadd.f32 1.0, %v1447_v19 }
 0x9d1   :  { %v616_v22 = vadd.f32 1.0, %v1449_v20 }
 0x9d2   :  { %1450 = vrcp.f32 %v687_v21  ;;  %v699_v37 = vand.u32 2147483648, %v687_v21  ;;  %vm693_vm15 = vweird.f32 %v687_v21  ;;  %v697_v38 = vand.u32 2147483647, %v687_v21 }
 0x9d3   :  { %1452 = vrcp.f32 %v616_v22  ;;  %v628_v45 = vand.u32 2147483648, %v616_v22  ;;  %vm622_vm3 = vweird.f32 %v616_v22  ;;  %v626_v48 = vand.u32 2147483647, %v616_v22 }
 0x9d4   :  { %v700_v27 = vor.u32 1.1754944e-38, %v699_v37  ;;  %vm698_vm4 = vcmp.eq.f32.partialorder %v697_v38, 8.507059e+37 }
 0x9d5   :  { %v629_v52 = vor.u32 1.1754944e-38, %v628_v45  ;;  %vm627_vm6 = vcmp.eq.f32.partialorder %v626_v48, 8.507059e+37 }
 0x9d8   :  { %v1451_v23 = vpop.eup %1450 }
 0x9d9   :  { %v1453_v24 = vpop.eup %1452  ;;  %v689_v25 = vmul.f32 %v1451_v23, %v687_v21  ;;  %vm694_vm14 = vweird.f32 %v1451_v23 }
 0x9da   :  { %v618_v26 = vmul.f32 %v1453_v24, %v616_v22  ;;  %vm695_vm1 = vmor %vm693_vm15, %vm694_vm14  ;;  %vm623_vm2 = vweird.f32 %v1453_v24 }
 0x9db   :  { %v690_v28 = vsub.f32 1.0, %v689_v25  ;;  %vm624_vm5 = vmor %vm622_vm3, %vm623_vm2 }
 0x9dc   :  { %v619_v29 = vsub.f32 1.0, %v618_v26 }
 0x9dd   :  { %v691_v30 = vmul.f32 %v1451_v23, %v690_v28 }
 0x9de   :  { %v620_v33 = vmul.f32 %v1453_v24, %v619_v29 }
 0x9df   :  { %v692_v36 = vadd.f32 %v1451_v23, %v691_v30 }
 0x9e0   :  { %v621_v41 = vadd.f32 %v1453_v24, %v620_v33 }
 0x9e1   :  { %v696_v42 = vsel %vm695_vm1, %v1451_v23, %v692_v36 }
 0x9e2   :  { %v701_v31 = vsel %vm698_vm4, %v700_v27, %v696_v42  ;;  %v625_v32 = vsel %vm624_vm5, %v1453_v24, %v621_v41 }
 0x9e3   :  { %v630_v54 = vsel %vm627_vm6, %v629_v52, %v625_v32  ;;  %v704_v56 = vmul.f32 %v701_v31, %v1817_v49 }
 0x9e4   :  { %v633_v60 = vmul.f32 %v630_v54, %v1813_v47 }
 0xa28   :  { %v707_v51 = vpop.permute.xlu2 %706 }
 0xa29   :  { %v709_v43 = vmul.f32 %v707_v51, %v701_v31 }
 0xa2b   :  { %711 = vrot.lane.b32.xlu1 %v709_v43, %s1594_s22 }
 0xa2c   :  { %v636_v53 = vpop.permute.xlu1 %635 }
 0xa2d   :  { %v638_v55 = vmul.f32 %v636_v53, %v630_v54 }
 0xa2f   :  { %640 = vrot.lane.b32.xlu0 %v638_v55, %s1594_s22 }
 0xa9d   :  { %v712_v58 = vpop.permute.xlu1 %711 }
 0xa9e   :  { %v1864_v59 = vadd.f32 %v712_v58, %v704_v56 }
 0xaa0   :  { %1454 = vtanh.f32 %v1864_v59 }
 0xaa1   :  { %v641_v61 = vpop.permute.xlu0 %640 }
 0xaa2   :  { %v1868_v62 = vadd.f32 %v641_v61, %v633_v60 }
 0xaa4   :  { %1456 = vtanh.f32 %v1868_v62 }
 0xaa6   :  { %v1455_v63 = vpop.eup %1454 }
 0xaa7   :  { %717 = vrot.lane.b32.xlu0 %v1455_v63, %s1593_s21 }
 0xaaa   :  { %v1457_v0 = vpop.eup %1456 }
 0xaab   :  { %646 = vrot.lane.b32.xlu2 %v1457_v0, %s1593_s21 }
 0xb05   :  { %v647_v4 = vpop.permute.xlu2 %646 }
 0xb06   :  { %v649_v49 = vmul.f32 %v647_v4, %v630_v54 }
 0xb08   :  { %v721_v5 = vpack.c.bf16 %v649_v49, %v649_v49 }
 0xb0a   :  { %723 = vrot.lane.b32.xlu1 %v721_v5, %s1594_s22 }
 0xb19   :  { %v718_v6 = vpop.permute.xlu0 %717 }
 0xb1a   :  { %v1874_v47 = vmul.f32 %v718_v6, %v701_v31 }
 0xb1c   :  { %v792_v7 = vpack.c.bf16 %v1874_v47, %v1874_v47 }
 0xb1e   :  { %794 = vrot.lane.b32.xlu2 %v792_v7, %s1594_s22 }
 0xb78   :  { %v795_v9 = vpop.permute.xlu2 %794 }
 0xb79   :  { %1352 = vmatmul.msk.bf16.vlgmr.msra.gmra.mxu3 %vm77_vm0, %v795_v9 }
 0xb7a   :  { %1141 = vmatpush.bf16.msra.mxu3 %v1710_v39 }
 0xb7c   :  { %v724_v3 = vpop.permute.xlu1 %723 }
 0xb7d   :  { %1349 = vmatmul.msk.bf16.vlgmr.msra.gmra.mxu1 %vm77_vm0, %v724_v3  ;;  %1351 = vmatmul.msk.bf16.vlgmr.msra.gmra.mxu2 %vm77_vm0, %v724_v3 }
 0xb7e   :  { %1063 = vmatpush.bf16.msra.mxu1 %v1710_v39  ;;  %1121 = vmatpush.bf16.msra.mxu2 %v1695_v34 }
 0xb7f   :  { %1142 = vmatpush.bf16.msra.mxu3 %v1716_v40 }
 0xb82   :  { %1064 = vmatpush.bf16.msra.mxu1 %v1716_v40  ;;  %1122 = vmatpush.bf16.msra.mxu2 %v1701_v35 }
 0xbfa   :  { %v737_v12 = vpop.f32.mrf.mxu1 }
 0xbfb   :  { %v741_v13 = vadd.f32 %v737_v12, %v112_v10  ;;  %v1917_v12 = vld [vmem:[%s2012_s3] ss:$0 sm:$0xff] }
 0xbfc   :  { %v808_v14 = vpop.f32.mrf.mxu3 }
 0xbfd   :  { %1458 = vtanh.f32 %v741_v13  ;;  %v1350_v35 = vmul.f32 -1.442695, %v741_v13  ;;  %v115_v13 = vadd.f32 %v1917_v12, %v1854_v1 }
 0xc00   :  { %v788_v15 = vpop.f32.mrf.mxu2 }
 0xc01   :  { %v789_v16 = vadd.f32 %v1737_v46, %v788_v15 }
 0xc02   :  { %v739_v17 = vpop.f32.mrf.mxu1 }
 0xc03   :  { %v1459_v39 = vpop.eup %1458  ;;  %v812_v18 = vadd.f32 %v808_v14, %v789_v16 }
 0xc04   :  { %764 = vrot.lane.b32.xlu0 %v1459_v39, %s1593_s21  ;;  %v810_v34 = vpop.f32.mrf.mxu3 }
 0xc05   :  { %1460 = vtanh.f32 %v812_v18  ;;  %v1353_v8 = vmul.f32 -1.442695, %v812_v18 }
 0xc06   :  { %1462 = vpow2.f32 %v1350_v35 }
 0xc07   :  { %1464 = vpow2.f32 %v1353_v8 }
 0xc08   :  { %v790_v40 = vpop.f32.mrf.mxu2 }
 0xc0b   :  { %v1461_v19 = vpop.eup %1460 }
 0xc0c   :  { %835 = vrot.lane.b32.xlu1 %v1461_v19, %s1593_s21  ;;  %v1463_v2 = vpop.eup %1462 }
 0xc0d   :  { %v745_v20 = vadd.f32 1.0, %v1463_v2  ;;  %v1465_v21 = vpop.eup %1464 }
 0xc0e   :  { %v816_v22 = vadd.f32 1.0, %v1465_v21 }
 0xc0f   :  { %1466 = vrcp.f32 %v745_v20  ;;  %v757_v36 = vand.u32 2147483648, %v745_v20  ;;  %vm751_vm8 = vweird.f32 %v745_v20  ;;  %v755_v37 = vand.u32 2147483647, %v745_v20 }
 0xc10   :  { %1468 = vrcp.f32 %v816_v22  ;;  %v828_v31 = vand.u32 2147483648, %v816_v22  ;;  %vm822_vm12 = vweird.f32 %v816_v22  ;;  %v826_v32 = vand.u32 2147483647, %v816_v22 }
 0xc11   :  { %v758_v42 = vor.u32 1.1754944e-38, %v757_v36  ;;  %vm756_vm10 = vcmp.eq.f32.partialorder %v755_v37, 8.507059e+37 }
 0xc12   :  { %v829_v52 = vor.u32 1.1754944e-38, %v828_v31  ;;  %vm827_vm14 = vcmp.eq.f32.partialorder %v826_v32, 8.507059e+37 }
 0xc15   :  { %v1467_v23 = vpop.eup %1466 }
 0xc16   :  { %v747_v24 = vmul.f32 %v1467_v23, %v745_v20  ;;  %v1469_v26 = vpop.eup %1468  ;;  %vm752_vm7 = vweird.f32 %v1467_v23 }
 0xc17   :  { %v818_v29 = vmul.f32 %v1469_v26, %v816_v22  ;;  %vm753_vm9 = vmor %vm751_vm8, %vm752_vm7  ;;  %vm823_vm11 = vweird.f32 %v1469_v26 }
 0xc18   :  { %v748_v25 = vsub.f32 1.0, %v747_v24  ;;  %vm824_vm13 = vmor %vm822_vm12, %vm823_vm11 }
 0xc19   :  { %v819_v33 = vsub.f32 1.0, %v818_v29 }
 0xc1a   :  { %v749_v28 = vmul.f32 %v1467_v23, %v748_v25 }
 0xc1b   :  { %v820_v41 = vmul.f32 %v1469_v26, %v819_v33 }
 0xc1c   :  { %v750_v30 = vadd.f32 %v1467_v23, %v749_v28 }
 0xc1d   :  { %v821_v51 = vadd.f32 %v1469_v26, %v820_v41 }
 0xc1e   :  { %v754_v38 = vsel %vm753_vm9, %v1467_v23, %v750_v30 }
 0xc1f   :  { %v759_v27 = vsel %vm756_vm10, %v758_v42, %v754_v38  ;;  %v825_v43 = vsel %vm824_vm13, %v1469_v26, %v821_v51 }
 0xc20   :  { %v830_v54 = vsel %vm827_vm14, %v829_v52, %v825_v43  ;;  %v762_v56 = vmul.f32 %v759_v27, %v1868_v62 }
 0xc21   :  { %v833_v63 = vmul.f32 %v830_v54, %v1864_v59 }
 0xc76   :  { %v765_v45 = vpop.permute.xlu0 %764 }
 0xc77   :  { %v767_v48 = vmul.f32 %v765_v45, %v759_v27 }
 0xc79   :  { %769 = vrot.lane.b32.xlu2 %v767_v48, %s1594_s22 }
 0xc7e   :  { %v836_v53 = vpop.permute.xlu1 %835 }
 0xc7f   :  { %v838_v55 = vmul.f32 %v836_v53, %v830_v54 }
 0xc81   :  { %840 = vrot.lane.b32.xlu0 %v838_v55, %s1594_s22 }
 0xcd3   :  { %v770_v58 = vpop.permute.xlu2 %769 }
 0xcd4   :  { %v1896_v60 = vadd.f32 %v770_v58, %v762_v56 }
 0xcd6   :  { %1470 = vtanh.f32 %v1896_v60 }
 0xcdc   :  { %v1471_v61 = vpop.eup %1470 }
 0xcdd   :  { %775 = vrot.lane.b32.xlu1 %v1471_v61, %s1593_s21 }
 0xcf3   :  { %v841_v0 = vpop.permute.xlu0 %840 }
 0xcf4   :  { %v1901_v4 = vadd.f32 %v841_v0, %v833_v63 }
 0xcf6   :  { %1472 = vtanh.f32 %v1901_v4 }
 0xcfc   :  { %v1473_v49 = vpop.eup %1472 }
 0xcfd   :  { %846 = vrot.lane.b32.xlu2 %v1473_v49, %s1593_s21 }
 0xd4f   :  { %v776_v5 = vpop.permute.xlu1 %775 }
 0xd50   :  { %v778_v62 = vmul.f32 %v776_v5, %v759_v27 }
 0xd52   :  { %v850_v6 = vpack.c.bf16 %v778_v62, %v778_v62 }
 0xd54   :  { %852 = vrot.lane.b32.xlu0 %v850_v6, %s1594_s22 }
 0xd57   :  { %v847_v7 = vpop.permute.xlu2 %846 }
 0xd58   :  { %v1906_v9 = vmul.f32 %v847_v7, %v830_v54 }
 0xd5a   :  { %v921_v3 = vpack.c.bf16 %v1906_v9, %v1906_v9 }
 0xd5c   :  { %923 = vrot.lane.b32.xlu1 %v921_v3, %s1594_s22 }
 0xdc6   :  { %v853_v59 = vpop.permute.xlu0 %852 }
 0xdc7   :  { %1354 = vmatmul.msk.bf16.vlgmr.msra.gmra.mxu0 %vm77_vm0, %v853_v59  ;;  %1356 = vmatmul.msk.bf16.vlgmr.msrb.gmra.mxu1 %vm77_vm0, %v853_v59 }
 0xdce   :  { %v924_v10 = vpop.permute.xlu1 %923 }
 0xdcf   :  { %1357 = vmatmul.msk.bf16.vlgmr.msrb.gmra.mxu2 %vm77_vm0, %v924_v10 }
 0xe44   :  { %v866_v14 = vpop.f32.mrf.mxu0  ;;  %v917_v15 = vpop.f32.mrf.mxu1 }
 0xe45   :  { %v870_v16 = vadd.f32 %v866_v14, %v115_v13  ;;  %v918_v34 = vadd.f32 %v1737_v46, %v917_v15  ;;  %v117_v15 = vadd.f32 %v1917_v12, %v1857_v11 }
 0xe47   :  { %1474 = vtanh.f32 %v870_v16  ;;  %v1355_v2 = vmul.f32 -1.442695, %v870_v16 }
 0xe4c   :  { %v868_v17 = vpop.f32.mrf.mxu0  ;;  %v919_v39 = vpop.f32.mrf.mxu1 }
 0xe4d   :  { %v1475_v18 = vpop.eup %1474 }
 0xe4e   :  { %893 = vrot.lane.b32.xlu2 %v1475_v18, %s1593_s21 }
 0xe52   :  { %v937_v40 = vpop.f32.mrf.mxu2 }
 0xe53   :  { %v941_v19 = vadd.f32 %v937_v40, %v918_v34  ;;  %v1951_v40 = vld [vmem:[%s2015_s6] ss:$0 sm:$0xff]  ;;  %s1595_s6 = smov 96  }
 0xe55   :  { %1476 = vtanh.f32 %v941_v19  ;;  %v1358_v25 = vmul.f32 -1.442695, %v941_v19 }
 0xe56   :  { %1478 = vpow2.f32 %v1355_v2 }
 0xe5a   :  { %v939_v35 = vpop.f32.mrf.mxu2 }
 0xe5b   :  { %v1477_v8 = vpop.eup %1476 }
 0xe5c   :  { %964 = vrot.lane.b32.xlu0 %v1477_v8, %s1593_s21  ;;  %v1479_v1 = vpop.eup %1478 }
 0xe5d   :  { %v874_v20 = vadd.f32 1.0, %v1479_v1 }
 0xe5f   :  { %1480 = vrcp.f32 %v874_v20  ;;  %v886_v46 = vand.u32 2147483648, %v874_v20  ;;  %vm880_vm1 = vweird.f32 %v874_v20  ;;  %v884_v28 = vand.u32 2147483647, %v874_v20 }
 0xe60   :  { %1482 = vpow2.f32 %v1358_v25 }
 0xe61   :  { %v887_v30 = vor.u32 1.1754944e-38, %v886_v46  ;;  %vm885_vm3 = vcmp.eq.f32.partialorder %v884_v28, 8.507059e+37 }
 0xe65   :  { %v1481_v21 = vpop.eup %1480 }
 0xe66   :  { %v876_v22 = vmul.f32 %v1481_v21, %v874_v20  ;;  %vm881_vm15 = vweird.f32 %v1481_v21  ;;  %v1483_v38 = vpop.eup %1482 }
 0xe67   :  { %vm882_vm2 = vmor %vm880_vm1, %vm881_vm15  ;;  %v945_v41 = vadd.f32 1.0, %v1483_v38 }
 0xe68   :  { %v877_v23 = vsub.f32 1.0, %v876_v22 }
 0xe69   :  { %1484 = vrcp.f32 %v945_v41  ;;  %v957_v31 = vand.u32 2147483648, %v945_v41  ;;  %vm951_vm5 = vweird.f32 %v945_v41  ;;  %v955_v32 = vand.u32 2147483647, %v945_v41 }
 0xe6a   :  { %v878_v24 = vmul.f32 %v1481_v21, %v877_v23 }
 0xe6b   :  { %v958_v52 = vor.u32 1.1754944e-38, %v957_v31  ;;  %vm956_vm7 = vcmp.eq.f32.partialorder %v955_v32, 8.507059e+37 }
 0xe6c   :  { %v879_v26 = vadd.f32 %v1481_v21, %v878_v24 }
 0xe6e   :  { %v883_v29 = vsel %vm882_vm2, %v1481_v21, %v879_v26 }
 0xe6f   :  { %v888_v33 = vsel %vm885_vm3, %v887_v30, %v883_v29  ;;  %v1485_v42 = vpop.eup %1484 }
 0xe70   :  { %v947_v45 = vmul.f32 %v1485_v42, %v945_v41  ;;  %vm952_vm4 = vweird.f32 %v1485_v42  ;;  %v891_v56 = vmul.f32 %v888_v33, %v1896_v60 }
 0xe71   :  { %vm953_vm6 = vmor %vm951_vm5, %vm952_vm4  ;;  %vm1211_vm5 = vcmask 523264  }
 0xe72   :  { %v948_v27 = vsub.f32 1.0, %v947_v45 }
 0xe74   :  { %v949_v48 = vmul.f32 %v1485_v42, %v948_v27 }
 0xe76   :  { %v950_v51 = vadd.f32 %v1485_v42, %v949_v48 }
 0xe78   :  { %v954_v43 = vsel %vm953_vm6, %v1485_v42, %v950_v51  ;;  %vm1213_vm6 = vcmask 785408  }
 0xe79   :  { %v959_v54 = vsel %vm956_vm7, %v958_v52, %v954_v43 }
 0xe7a   :  { %v962_v0 = vmul.f32 %v959_v54, %v1901_v4 }
 0xea8   :  { %v894_v36 = vpop.permute.xlu2 %893 }
 0xea9   :  { %v896_v37 = vmul.f32 %v894_v36, %v888_v33 }
 0xeab   :  { %898 = vrot.lane.b32.xlu1 %v896_v37, %s1594_s22 }
 0xece   :  { %v965_v53 = vpop.permute.xlu0 %964 }
 0xecf   :  { %v967_v55 = vmul.f32 %v965_v53, %v959_v54 }
 0xed1   :  { %969 = vrot.lane.b32.xlu2 %v967_v55, %s1594_s22 }
 0xf1d   :  { %v899_v58 = vpop.permute.xlu1 %898 }
 0xf1e   :  { %v1927_v61 = vadd.f32 %v899_v58, %v891_v56 }
 0xf20   :  { %1486 = vtanh.f32 %v1927_v61 }
 0xf26   :  { %v1487_v63 = vpop.eup %1486 }
 0xf27   :  { %904 = vrot.lane.b32.xlu0 %v1487_v63, %s1593_s21 }
 0xf2b   :  { %v970_v49 = vpop.permute.xlu2 %969 }
 0xf2c   :  { %v1932_v5 = vadd.f32 %v970_v49, %v962_v0 }
 0xf2e   :  { %1488 = vtanh.f32 %v1932_v5 }
 0xf34   :  { %v1489_v62 = vpop.eup %1488 }
 0xf35   :  { %975 = vrot.lane.b32.xlu1 %v1489_v62, %s1593_s21 }
 0xf99   :  { %v905_v6 = vpop.permute.xlu0 %904 }
 0xf9a   :  { %v907_v60 = vmul.f32 %v905_v6, %v888_v33 }
 0xf9c   :  { %v979_v7 = vpack.c.bf16 %v907_v60, %v907_v60 }
 0xf9e   :  { %981 = vrot.lane.b32.xlu2 %v979_v7, %s1594_s22 }
 0xfa7   :  { %v976_v3 = vpop.permute.xlu1 %975 }
 0xfa8   :  { %v1937_v59 = vmul.f32 %v976_v3, %v959_v54 }
 0xfaa   :  { %v1050_v10 = vpack.c.bf16 %v1937_v59, %v1937_v59 }
 0xfac   :  { %1052 = vrot.lane.b32.xlu0 %v1050_v10, %s1594_s22 }
 0xff8   :  { %v982_v4 = vpop.permute.xlu2 %981 }
 0xff9   :  { %1359 = vmatmul.msk.bf16.vlgmr.msrb.gmra.mxu3 %vm77_vm0, %v982_v4  ;;  %1361 = vmatmul.msk.bf16.vlgmr.msrb.gmra.mxu0 %vm77_vm0, %v982_v4 }
0x101e   :  { %v1053_v13 = vpop.permute.xlu0 %1052 }
0x101f   :  { %1362 = vmatmul.msk.bf16.vlgmr.msra.gmra.mxu1 %vm77_vm0, %v1053_v13 }
0x1076   :  { %v1046_v14 = vpop.f32.mrf.mxu0 }
0x1077   :  { %v1047_v19 = vadd.f32 %v1951_v40, %v1046_v14 }
0x107c   :  { %v995_v16 = vpop.f32.mrf.mxu3 }
0x107d   :  { %v999_v17 = vadd.f32 %v995_v16, %v117_v15 }
0x107e   :  { %v1048_v39 = vpop.f32.mrf.mxu0 }
0x107f   :  { %1490 = vtanh.f32 %v999_v17  ;;  %v1360_v12 = vmul.f32 -1.442695, %v999_v17 }
0x1084   :  { %v997_v18 = vpop.f32.mrf.mxu3 }
0x1085   :  { %v1491_v34 = vpop.eup %1490 }
0x1086   :  { %1022 = vrot.lane.b32.xlu1 %v1491_v34, %s1593_s21 }
0x109c   :  { %v1066_v35 = vpop.f32.mrf.mxu1 }
0x109d   :  { %v1070_v8 = vadd.f32 %v1066_v35, %v1047_v19 }
0x109f   :  { %1492 = vtanh.f32 %v1070_v8  ;;  %v1363_v1 = vmul.f32 -1.442695, %v1070_v8 }
0x10a0   :  { %1494 = vpow2.f32 %v1360_v12 }
0x10a1   :  { %1496 = vpow2.f32 %v1363_v1 }
0x10a4   :  { %v1068_v2 = vpop.f32.mrf.mxu1 }
0x10a5   :  { %v1493_v11 = vpop.eup %1492 }
0x10a6   :  { %1093 = vrot.lane.b32.xlu2 %v1493_v11, %s1593_s21  ;;  %v1495_v20 = vpop.eup %1494 }
0x10a7   :  { %v1003_v21 = vadd.f32 1.0, %v1495_v20  ;;  %v1497_v22 = vpop.eup %1496 }
0x10a8   :  { %v1074_v23 = vadd.f32 1.0, %v1497_v22 }
0x10a9   :  { %1498 = vrcp.f32 %v1003_v21  ;;  %v1015_v36 = vand.u32 2147483648, %v1003_v21  ;;  %vm1009_vm9 = vweird.f32 %v1003_v21  ;;  %v1013_v37 = vand.u32 2147483647, %v1003_v21 }
0x10aa   :  { %1500 = vrcp.f32 %v1074_v23  ;;  %v1086_v31 = vand.u32 2147483648, %v1074_v23  ;;  %vm1080_vm13 = vweird.f32 %v1074_v23  ;;  %v1084_v32 = vand.u32 2147483647, %v1074_v23 }
0x10ab   :  { %v1016_v42 = vor.u32 1.1754944e-38, %v1015_v36  ;;  %vm1014_vm11 = vcmp.eq.f32.partialorder %v1013_v37, 8.507059e+37 }
0x10ac   :  { %v1087_v52 = vor.u32 1.1754944e-38, %v1086_v31  ;;  %vm1085_vm15 = vcmp.eq.f32.partialorder %v1084_v32, 8.507059e+37 }
0x10af   :  { %v1499_v24 = vpop.eup %1498 }
0x10b0   :  { %v1005_v25 = vmul.f32 %v1499_v24, %v1003_v21  ;;  %v1501_v46 = vpop.eup %1500  ;;  %vm1010_vm8 = vweird.f32 %v1499_v24 }
0x10b1   :  { %v1076_v29 = vmul.f32 %v1501_v46, %v1074_v23  ;;  %vm1011_vm10 = vmor %vm1009_vm9, %vm1010_vm8  ;;  %vm1081_vm12 = vweird.f32 %v1501_v46 }
0x10b2   :  { %v1006_v26 = vsub.f32 1.0, %v1005_v25  ;;  %vm1082_vm14 = vmor %vm1080_vm13, %vm1081_vm12 }
0x10b3   :  { %v1077_v33 = vsub.f32 1.0, %v1076_v29 }
0x10b4   :  { %v1007_v28 = vmul.f32 %v1499_v24, %v1006_v26 }
0x10b5   :  { %v1078_v41 = vmul.f32 %v1501_v46, %v1077_v33 }
0x10b6   :  { %v1008_v30 = vadd.f32 %v1499_v24, %v1007_v28 }
0x10b7   :  { %v1079_v51 = vadd.f32 %v1501_v46, %v1078_v41 }
0x10b8   :  { %v1012_v38 = vsel %vm1011_vm10, %v1499_v24, %v1008_v30 }
0x10b9   :  { %v1017_v27 = vsel %vm1014_vm11, %v1016_v42, %v1012_v38  ;;  %v1083_v43 = vsel %vm1082_vm14, %v1501_v46, %v1079_v51 }
0x10ba   :  { %v1088_v54 = vsel %vm1085_vm15, %v1087_v52, %v1083_v43  ;;  %v1020_v56 = vmul.f32 %v1017_v27, %v1927_v61 }
0x10bb   :  { %v1091_v0 = vmul.f32 %v1088_v54, %v1932_v5 }
0x10f8   :  { %v1023_v45 = vpop.permute.xlu1 %1022 }
0x10f9   :  { %v1025_v48 = vmul.f32 %v1023_v45, %v1017_v27 }
0x10fb   :  { %1027 = vrot.lane.b32.xlu0 %v1025_v48, %s1594_s22 }
0x1100   :  { %v1094_v53 = vpop.permute.xlu2 %1093 }
0x1101   :  { %v1096_v55 = vmul.f32 %v1094_v53, %v1088_v54 }
0x1103   :  { %1098 = vrot.lane.b32.xlu1 %v1096_v55, %s1594_s22 }
0x116d   :  { %v1028_v58 = vpop.permute.xlu0 %1027 }
0x116e   :  { %v1958_v63 = vadd.f32 %v1028_v58, %v1020_v56 }
0x1170   :  { %1502 = vtanh.f32 %v1958_v63 }
0x1175   :  { %v1099_v49 = vpop.permute.xlu1 %1098 }
0x1176   :  { %v1503_v62 = vpop.eup %1502  ;;  %v1101_v6 = vadd.f32 %v1099_v49, %v1091_v0 }
0x1177   :  { %1033 = vrot.lane.b32.xlu2 %v1503_v62, %s1593_s21 }
0x1178   :  { %1504 = vtanh.f32 %v1101_v6 }
0x117e   :  { %v1505_v60 = vpop.eup %1504 }
0x117f   :  { %1104 = vrot.lane.b32.xlu0 %v1505_v60, %s1593_s21 }
0x11d1   :  { %v1034_v7 = vpop.permute.xlu2 %1033 }
0x11d2   :  { %v1036_v3 = vmul.f32 %v1034_v7, %v1017_v27 }
0x11d4   :  { %v1108_v10 = vpack.c.bf16 %v1036_v3, %v1036_v3 }
0x11d6   :  { %1110 = vrot.lane.b32.xlu1 %v1108_v10, %s1594_s22 }
0x11f1   :  { %v1105_v61 = vpop.permute.xlu0 %1104 }
0x11f2   :  { %v1965_v4 = vmul.f32 %v1105_v61, %v1088_v54 }
0x11f4   :  { %v1128_v5 = vpack.c.bf16 %v1965_v4, %v1965_v4 }
0x11f6   :  { %1130 = vrot.lane.b32.xlu2 %v1128_v5, %s1594_s22 }
0x1248   :  { %v1111_v13 = vpop.permute.xlu1 %1110 }
0x1249   :  { %1364 = vmatmul.msk.bf16.vlgmr.msra.gmra.mxu2 %vm77_vm0, %v1111_v13 }
0x1250   :  { %v1131_v14 = vpop.permute.xlu2 %1130 }
0x1251   :  { %1365 = vmatmul.msk.bf16.vlgmr.msra.gmra.mxu3 %vm77_vm0, %v1131_v14 }
0x12cc   :  { %v1124_v15 = vpop.f32.mrf.mxu2 }
0x12cd   :  { %v1125_v16 = vadd.f32 %v1951_v40, %v1124_v15 }
0x12d4   :  { %v1126_v17 = vpop.f32.mrf.mxu2  ;;  %v1144_v39 = vpop.f32.mrf.mxu3 }
0x12d5   :  { %v1148_v18 = vadd.f32 %v1144_v39, %v1125_v16 }
0x12d7   :  { %1506 = vtanh.f32 %v1148_v18  ;;  %v1366_v35 = vmul.f32 -1.442695, %v1148_v18 }
0x12d9   :  { %1508 = vpow2.f32 %v1366_v35 }
0x12dc   :  { %v1146_v34 = vpop.f32.mrf.mxu3 }
0x12dd   :  { %v1507_v19 = vpop.eup %1506 }
0x12de   :  { %1171 = vrot.lane.b32.xlu0 %v1507_v19, %s1593_s21 }
0x12df   :  { %v1509_v8 = vpop.eup %1508 }
0x12e0   :  { %v1152_v40 = vadd.f32 1.0, %v1509_v8 }
0x12e2   :  { %1510 = vrcp.f32 %v1152_v40  ;;  %v1164_v21 = vand.u32 2147483648, %v1152_v40  ;;  %vm1158_vm2 = vweird.f32 %v1152_v40  ;;  %v1162_v22 = vand.u32 2147483647, %v1152_v40 }
0x12e4   :  { %v1165_v23 = vor.u32 1.1754944e-38, %v1164_v21  ;;  %vm1163_vm4 = vcmp.eq.f32.partialorder %v1162_v22, 8.507059e+37 }
0x12e6   :  { %1187 = vrot.lane.b32.xlu0 %v1761_v44, %s1594_s22 }
0x12e8   :  { %v1511_v2 = vpop.eup %1510 }
0x12e9   :  { %v1154_v11 = vmul.f32 %v1511_v2, %v1152_v40  ;;  %vm1159_vm1 = vweird.f32 %v1511_v2 }
0x12ea   :  { %vm1160_vm3 = vmor %vm1158_vm2, %vm1159_vm1 }
0x12eb   :  { %v1155_v12 = vsub.f32 1.0, %v1154_v11 }
0x12ed   :  { %v1156_v1 = vmul.f32 %v1511_v2, %v1155_v12 }
0x12ee   :  { %1203 = vrot.lane.b32.xlu0 %v1937_v59, %s1593_s21 }
0x12ef   :  { %v1157_v20 = vadd.f32 %v1511_v2, %v1156_v1 }
0x12f1   :  { %v1161_v44 = vsel %vm1160_vm3, %v1511_v2, %v1157_v20 }
0x12f2   :  { %v1166_v24 = vsel %vm1163_vm4, %v1165_v23, %v1161_v44 }
0x12f3   :  { %v1169_v29 = vmul.f32 %v1166_v24, %v1101_v6 }
0x12f6   :  { %1221 = vrot.lane.b32.xlu0 %v1036_v3, %s1594_s22 }
0x1350   :  { %v1172_v59 = vpop.permute.xlu0 %1171 }
0x1351   :  { %v1174_v25 = vmul.f32 %v1172_v59, %v1166_v24 }
0x1353   :  { %1176 = vrot.lane.b32.xlu1 %v1174_v25, %s1594_s22 }
0x1358   :  { %v1188_v26 = vpop.permute.xlu0 %1187 }
0x135b   :  { %1191 = vrot.lane.b32.xlu1 %v1791_v50, %s1593_s21 }
0x1360   :  { %v1204_v46 = vpop.permute.xlu0 %1203 }
0x1363   :  { %1195 = vrot.lane.b32.xlu1 %v1829_v57, %s1595_s6 }
0x1368   :  { %v1222_v28 = vpop.permute.xlu0 %1221 }
0x1369   :  { %1224 = vst.msk [vmem:[#allocation4] sm:$0xff] %vm77_vm0, %v1222_v28 }
0x13c5   :  { %v1177_v30 = vpop.permute.xlu1 %1176 }
0x13c6   :  { %v1179_v33 = vadd.f32 %v1177_v30, %v1169_v29 }
0x13c8   :  { %1512 = vtanh.f32 %v1179_v33  ;;  %1237 = vrot.lane.b32.xlu0 %v1179_v33, %s1595_s6 }
0x13cd   :  { %v1192_v36 = vpop.permute.xlu1 %1191 }
0x13ce   :  { %v1513_v37 = vpop.eup %1512  ;;  %v1210_v50 = vsel %vm77_vm0, %v1188_v26, %v1192_v36 }
0x13cf   :  { %1182 = vrot.lane.b32.xlu2 %v1513_v37, %s1593_s21  ;;  %s1596_s21 = smov [#allocation2]  }
0x13d0   :  { %s1247_s24 = sshll.u32 %s1596_s21, 4  ;;  %s1248_s24 = int_to_ptr.vmem [resolvable:$true] %s1247_s24 }
0x13d5   :  { %v1196_v38 = vpop.permute.xlu1 %1195 }
0x13d6   :  { %v1212_v41 = vsel %vm1211_vm5, %v1210_v50, %v1196_v38 }
0x13d7   :  { %1199 = vrot.lane.b32.xlu2 %v1906_v9, %s1594_s22  ;;  %v1214_v57 = vsel %vm1213_vm6, %v1212_v41, %v1874_v47 }
0x13d8   :  { %1218 = vst [vmem:[#allocation2] sm:$0xff] %v1214_v57 }
0x13df   :  { %1207 = vrot.lane.b32.xlu2 %v1965_v4, %s1595_s6 }
0x13e7   :  { %1232 = vrot.lane.b32.xlu2 %v1958_v63, %s1595_s6 }
0x1429   :  { %v1183_v42 = vpop.permute.xlu2 %1182 }
0x142a   :  { %v1185_v45 = vmul.f32 %v1183_v42, %v1166_v24 }
0x142c   :  { %1226 = vrot.lane.b32.xlu1 %v1185_v45, %s1594_s22  ;;  %s1597_s22 = smov [#allocation4]  }
0x142d   :  { %s1257_s28 = sshll.u32 %s1597_s22, 4  ;;  %s1258_s28 = int_to_ptr.vmem [resolvable:$true] %s1257_s28 }
0x1431   :  { %v1200_v27 = vpop.permute.xlu2 %1199 }
0x1432   :  { %v1215_v9 = vsel %vm77_vm0, %v1200_v27, %v1204_v46 }
0x1439   :  { %v1208_v48 = vpop.permute.xlu2 %1207 }
0x143a   :  { %v1216_v47 = vsel %vm1211_vm5, %v1215_v9, %v1208_v48  ;;  %v1238_v51 = vpop.permute.xlu0 %1237 }
0x143b   :  { %1241 = vst.msk [vmem:[#allocation6 + $0x8] sm:$0xff] %vm77_vm0, %v1238_v51  ;;  %v1217_v31 = vsel %vm1213_vm6, %v1216_v47, %v1185_v45 }
0x143c   :  { %1219 = vst [vmem:[#allocation2 + $0x8] sm:$0xff] %v1217_v31 }
0x143d   :  { %1252 = dma.vmem_to_hbm [thread:$0]  %s1248_s24, 256, %s1250_s27, [#allocation3]  }
0x1441   :  { %v1233_v32 = vpop.permute.xlu2 %1232 }
0x1442   :  { %1235 = vst.msk [vmem:[#allocation6] sm:$0xff] %vm77_vm0, %v1233_v32 }
0x149e   :  { %v1227_v43 = vpop.permute.xlu1 %1226 }
0x149f   :  { %1230 = vst.msk [vmem:[#allocation4 + $0x8] sm:$0xff] %vm77_vm0, %v1227_v43 }
0x14a0   :  { %1265 = dma.vmem_to_hbm [thread:$0]  %s1258_s28, 256, %s1260_s29, [#allocation5], %s1599_s13, %s1599_s13, %s1600_s14  }
0x14a1   :  { %1278 = dma.vmem_to_hbm [thread:$0]  %s1271_s30, 256, %s1273_s12, [#allocation5], %s1599_s13, %s1599_s13, %s1600_s14  }
0x14a2   :  { %1588 = dma.done.wait [#allocation3], 256  }
0x14a3   :  { %1589 = vsyncadd [#allocation3], 4294967040 }
0x14a4   :  { %1590 = dma.done.wait [#allocation5], 512  }
0x14a5   :  { %1591 = vsyncadd [#allocation5], 4294966784 }
0x14a6   :  { %1291 = vsyncpa [#allocation3], 1 }
0x14a7   :  { %1292 = vsyncpa [#allocation5], 1 }

</bundles_post_ra>
